<compile_context>
chip_gen: v5e
topology: v5e:2x2
jax: 0.10.0
libtpu: 0.0.40
codegen_flags: <defaults>
</compile_context>

<pallas_src>
import functools
import math

import jax
import jax.numpy as jnp
from jax import lax
from jax.experimental import pallas as pl
from jax.experimental.pallas import tpu as pltpu


ACT_DTYPE = jnp.bfloat16          # inter-layer activation storage dtype
_VMEM_LIMIT = 40 * 1024 * 1024    # worst-case working set ~18 MiB; fits v7x 64 MiB/TC
_LSTM_T_CHUNK = 128               # time-chunk for the streamed LSTM recurrence


# ----------------------------------------------------------------------------
# Tiling helpers
# ----------------------------------------------------------------------------
def _round_up(v, m):
    return ((v + m - 1) // m) * m


def _pad2(a, r, c):
    return jnp.pad(a, ((0, r - a.shape[0]), (0, c - a.shape[1])))


def _tile_plan(R, C, K):
    """Pick (tr, tc, tk, Rp, Cp, Kp).  Small K is NOT padded to 128: a single
    full-K block is used (exempt from the 128-lane rule), padded only to 16."""
    if R <= 512:
        Rp = _round_up(max(R, 1), 16)
        tr = Rp
    else:
        Rp = _round_up(R, 256)
        tr = 256
    if C <= 1024:
        Cp = _round_up(max(C, 1), 128)
        tc = Cp
    elif C <= 8192:
        Cp = _round_up(C, 128)
        tc = next(c for c in (1024, 896, 768, 640, 512, 384, 256, 128)
                  if Cp % c == 0)
    else:
        Cp = _round_up(C, 1024)
        tc = 1024
    if K <= 1024:
        Kp = _round_up(max(K, 1), 16)   # bf16 sublane multiple; single k block
        tk = Kp
    else:
        Kp = _round_up(K, 512)
        tk = 512
    return tr, tc, tk, Rp, Cp, Kp


def _mosaic_params():
    return pltpu.CompilerParams(
        dimension_semantics=("parallel", "parallel", "arbitrary"),
        vmem_limit_bytes=_VMEM_LIMIT)
    # TODO(synk): set allow_input_fusion so the pad/cast of X fuses into the
    # kernel's input DMA instead of a separate HBM pass.


# ----------------------------------------------------------------------------
# Tiled matmul kernels (rows tiled on sublanes, big B*L axis lane-dense)
# ----------------------------------------------------------------------------
def _mm_kernel(*refs, act, has_bias):
    """O = act(A @ X + bias), accumulated over the k grid axis."""
    if has_bias:
        a_ref, x_ref, b_ref, o_ref, acc_ref = refs
    else:
        a_ref, x_ref, o_ref, acc_ref = refs
        b_ref = None

    @pl.when(pl.program_id(2) == 0)
    def _():
        if b_ref is None:
            acc_ref[...] = jnp.zeros_like(acc_ref)
        else:
            acc_ref[...] = b_ref[...] + jnp.zeros_like(acc_ref)  # bias-as-init

    acc_ref[...] += jnp.dot(a_ref[...], x_ref[...],
                            preferred_element_type=jnp.float32)

    @pl.when(pl.program_id(2) == pl.num_programs(2) - 1)
    def _():
        y = acc_ref[...]
        if act == "relu":
            y = jnp.maximum(y, 0.0)
        o_ref[...] = y.astype(o_ref.dtype)


def _mm_glu_kernel(*refs, half, has_skip):
    """One double-height dot: rows [0:half] are value, [half:2*half] gate.
    Optional skip operand is added to X at load time (fused skip-add)."""
    if has_skip:
        a_ref, x_ref, s_ref, b_ref, o_ref, acc_ref = refs
    else:
        a_ref, x_ref, b_ref, o_ref, acc_ref = refs
        s_ref = None

    @pl.when(pl.program_id(2) == 0)
    def _():
        acc_ref[...] = b_ref[...] + jnp.zeros_like(acc_ref)

    xb = x_ref[...]
    if s_ref is not None:
        xb = xb + s_ref[...]
    acc_ref[...] += jnp.dot(a_ref[...], xb, preferred_element_type=jnp.float32)

    @pl.when(pl.program_id(2) == pl.num_programs(2) - 1)
    def _():
        v = acc_ref[:half, :]
        g = acc_ref[half:, :]
        o_ref[...] = (v * jax.nn.sigmoid(g)).astype(o_ref.dtype)


def mm_act(a, x, bias=None, act="none", bias_axis=0, out_dtype=jnp.float32):
    """act(A @ X + bias); A:(R,K), X:(K,C) -> (R,C).
    bias_axis=0: bias per row (R,); bias_axis=1: bias per column (C,)."""
    R, K = a.shape
    K2, C = x.shape
    assert K == K2
    tr, tc, tk, Rp, Cp, Kp = _tile_plan(R, C, K)
    a_p = _pad2(a.astype(jnp.bfloat16), Rp, Kp)
    x_p = _pad2(x.astype(jnp.bfloat16), Kp, Cp)
    operands = [a_p, x_p]
    in_specs = [pl.BlockSpec((tr, tk), lambda i, j, k: (i, k)),
                pl.BlockSpec((tk, tc), lambda i, j, k: (k, j))]
    if bias is not None:
        if bias_axis == 0:
            operands.append(_pad2(bias.reshape(R, 1).astype(jnp.float32), Rp, 1))
            in_specs.append(pl.BlockSpec((tr, 1), lambda i, j, k: (i, 0)))
        else:
            operands.append(_pad2(bias.reshape(1, C).astype(jnp.float32), 1, Cp))
            in_specs.append(pl.BlockSpec((1, tc), lambda i, j, k: (0, j)))
    grid = (Rp // tr, Cp // tc, Kp // tk)
    cost = pl.CostEstimate(
        flops=2 * Rp * Cp * Kp, transcendentals=0,
        bytes_accessed=2 * (Rp * Kp + Kp * Cp)
        + Rp * Cp * jnp.dtype(out_dtype).itemsize)
    out = pl.pallas_call(
        functools.partial(_mm_kernel, act=act, has_bias=bias is not None),
        grid=grid, in_specs=in_specs,
        out_specs=pl.BlockSpec((tr, tc), lambda i, j, k: (i, j)),
        out_shape=jax.ShapeDtypeStruct((Rp, Cp), out_dtype),
        scratch_shapes=[pltpu.VMEM((tr, tc), jnp.float32)],
        compiler_params=_mosaic_params(),
        cost_estimate=cost,
    )(*operands)
    return out if (Rp == R and Cp == C) else out[:R, :C]


def mm_glu(av, ag, x, bv, bg, x_add=None, out_dtype=ACT_DTYPE):
    """(Av@(X[+Xadd]) + bv) * sigmoid(Ag@(X[+Xadd]) + bg); Av,Ag:(H,K), X:(K,C)."""
    H, K = av.shape
    K2, C = x.shape
    assert K == K2 and ag.shape == av.shape
    tr, tc, tk, Hp, Cp, Kp = _tile_plan(H, C, K)
    nb = Hp // tr

    def prep_a(m):
        return _pad2(m.astype(jnp.bfloat16), Hp, Kp).reshape(nb, tr, Kp)

    def prep_b(v):
        return _pad2(v.reshape(H, 1).astype(jnp.float32), Hp, 1).reshape(nb, tr, 1)

    # Interleave value/gate blocks per row tile so one (2*tr, tk) LHS block
    # carries both halves of the same output rows.
    a_cat = jnp.concatenate([prep_a(av), prep_a(ag)], axis=1).reshape(2 * Hp, Kp)
    b_cat = jnp.concatenate([prep_b(bv), prep_b(bg)], axis=1).reshape(2 * Hp, 1)
    x_p = _pad2(x.astype(jnp.bfloat16), Kp, Cp)

    operands = [a_cat, x_p]
    in_specs = [pl.BlockSpec((2 * tr, tk), lambda i, j, k: (i, k)),
                pl.BlockSpec((tk, tc), lambda i, j, k: (k, j))]
    if x_add is not None:
        operands.append(_pad2(x_add.astype(jnp.bfloat16), Kp, Cp))
        in_specs.append(pl.BlockSpec((tk, tc), lambda i, j, k: (k, j)))
    operands.append(b_cat)
    in_specs.append(pl.BlockSpec((2 * tr, 1), lambda i, j, k: (i, 0)))

    grid = (Hp // tr, Cp // tc, Kp // tk)
    n_x = 2 if x_add is not None else 1
    cost = pl.CostEstimate(
        flops=4 * Hp * Cp * Kp, transcendentals=Hp * Cp,
        bytes_accessed=2 * (2 * Hp * Kp + n_x * Kp * Cp)
        + Hp * Cp * jnp.dtype(out_dtype).itemsize)
    out = pl.pallas_call(
        functools.partial(_mm_glu_kernel, half=tr, has_skip=x_add is not None),
        grid=grid, in_specs=in_specs,
        out_specs=pl.BlockSpec((tr, tc), lambda i, j, k: (i, j)),
        out_shape=jax.ShapeDtypeStruct((Hp, Cp), out_dtype),
        scratch_shapes=[pltpu.VMEM((2 * tr, tc), jnp.float32)],
        compiler_params=_mosaic_params(),
        cost_estimate=cost,
    )(*operands)
    return out if (Hp == H and Cp == C) else out[:H, :C]


# ----------------------------------------------------------------------------
# LSTM: hoisted input projection + streamed recurrence over time chunks
# ----------------------------------------------------------------------------
def _lstm_rec_kernel(gx_ref, whh_ref, o_ref, h_scr, c_scr):
    """gx_ref: (tT, B, 4D) f32 precomputed x@W_ih + b, gates reordered [i,f,o,g];
    whh_ref: (D, 4D) bf16.  h/c carried in VMEM scratch across time chunks."""
    D = h_scr.shape[-1]
    tT = gx_ref.shape[0]

    @pl.when(pl.program_id(0) == 0)
    def _():
        h_scr[...] = jnp.zeros_like(h_scr)
        c_scr[...] = jnp.zeros_like(c_scr)

    def step(t, carry):
        gates = gx_ref[t] + jnp.dot(h_scr[...].astype(whh_ref.dtype), whh_ref[...],
                                    preferred_element_type=jnp.float32)
        sig = jax.nn.sigmoid(gates[:, :3 * D])      # one sigmoid over i|f|o
        i_g = sig[:, 0:D]
        f_g = sig[:, D:2 * D]
        o_g = sig[:, 2 * D:3 * D]
        g_g = jnp.tanh(gates[:, 3 * D:4 * D])
        c = f_g * c_scr[...] + i_g * g_g
        h = o_g * jnp.tanh(c)
        c_scr[...] = c
        h_scr[...] = h
        o_ref[t] = h.astype(o_ref.dtype)
        return carry

    lax.fori_loop(0, tT, step, 0)


def lstm_layer_tm(xt, w_ih, w_hh, b_ih, b_hh, B, T, out_dtype=ACT_DTYPE):
    """xt: (T*B, Din) time-major rows; returns h: (T*B, D) time-major rows."""
    D = w_hh.shape[1]
    # Reorder PyTorch gate blocks [i, f, g, o] -> [i, f, o, g]
    perm = jnp.concatenate([jnp.arange(0, D), jnp.arange(D, 2 * D),
                            jnp.arange(3 * D, 4 * D), jnp.arange(2 * D, 3 * D)])
    wih_rT = jnp.transpose(w_ih[perm])                       # (Din, 4D)
    whh_rT = jnp.transpose(w_hh[perm]).astype(jnp.bfloat16)  # (D, 4D) bf16 MXU
    bias_r = (b_ih + b_hh)[perm]                             # (4D,)

    # Hoisted input projection directly in time-major layout (no transposes).
    gx = mm_act(xt, wih_rT, bias_r, act="none", bias_axis=1,
                out_dtype=jnp.float32)                        # (T*B, 4D)
    gx = gx.reshape(T, B, 4 * D)

    if T <= _LSTM_T_CHUNK:
        tT, Tp = T, T
    else:
        tT = _LSTM_T_CHUNK
        Tp = _round_up(T, tT)
        gx = jnp.pad(gx, ((0, Tp - T), (0, 0), (0, 0)))

    # TODO(synk): for very wide models (D~2048) also stream W_hh column blocks
    # from HBM, and split the batch over both TensorCores on v7x.
    h = pl.pallas_call(
        _lstm_rec_kernel,
        grid=(Tp // tT,),
        in_specs=[pl.BlockSpec((tT, B, 4 * D), lambda t: (t, 0, 0)),
                  pl.BlockSpec((D, 4 * D), lambda t: (0, 0))],
        out_specs=pl.BlockSpec((tT, B, D), lambda t: (t, 0, 0)),
        out_shape=jax.ShapeDtypeStruct((Tp, B, D), out_dtype),
        scratch_shapes=[pltpu.VMEM((B, D), jnp.float32),   # h state
                        pltpu.VMEM((B, D), jnp.float32)],  # c state
        compiler_params=pltpu.CompilerParams(
            dimension_semantics=("arbitrary",),
            vmem_limit_bytes=_VMEM_LIMIT),
    )(gx, whh_rT)
    return h[:T].reshape(T * B, D)


# ----------------------------------------------------------------------------
# Conv wrappers — channels-first (C, B, L) activations
# ----------------------------------------------------------------------------
def conv1d_cf(x, w, b, stride, act, skip=None, out_dtype=ACT_DTYPE):
    """x: (Cin, B, L); w: (Cout, Cin, K) torch layout; optional skip is added
    to x inside the GLU kernel (1x1 path only).  Returns (Cout_eff, B, Lout)."""
    Cin, B, L = x.shape
    Cout, _, K = w.shape
    if K == 1 and stride == 1:
        xm = x.reshape(Cin, B * L)
        sm = None if skip is None else skip.reshape(Cin, B * L)
        wm = w[:, :, 0]                                   # (Cout, Cin)
        Lout = L
    else:
        # TODO(synk): move im2col into the kernel (halo DMA + K/stride shifted
        # sub-matmuls) to avoid the K/stride-fold patch duplication in HBM.
        assert skip is None
        Lout = (L - K) // stride + 1
        cols = [x[:, :, k:k + (Lout - 1) * stride + 1:stride] for k in range(K)]
        xm = jnp.stack(cols, axis=0).reshape(K * Cin, B * Lout)
        sm = None
        wm = jnp.transpose(w, (0, 2, 1)).reshape(Cout, K * Cin)
    if act == "glu":
        h = Cout // 2
        y = mm_glu(wm[:h], wm[h:], xm, b[:h], b[h:], x_add=sm, out_dtype=out_dtype)
    else:
        y = mm_act(wm, xm, b, act=act, bias_axis=0, out_dtype=out_dtype)
    return y.reshape(y.shape[0], B, Lout)


def conv_transpose1d_cf(x, w, b, stride, relu, out_dtype=jnp.float32):
    """x: (Cin, B, L); w: (Cin, Cout, K) torch ConvTranspose1d layout."""
    Cin, B, L = x.shape
    _, Cout, K = w.shape
    # Projection matmul: rows = Cout*K, cols = B*L (lane-dense), no bias.
    wm = jnp.transpose(w, (1, 2, 0)).reshape(Cout * K, Cin)
    y = mm_act(wm, x.reshape(Cin, B * L), bias=None, act="none",
               out_dtype=jnp.float32)
    y = y.reshape(Cout, K, B, L)
    Lout = (L - 1) * stride + K
    if K % stride == 0:
        # Overlap-add via K//stride pad+adds; bias/ReLU/cast fused in the same
        # elementwise expression (single XLA fusion under jit).
        out = None
        for q in range(K // stride):
            blk = jnp.transpose(y[:, q * stride:(q + 1) * stride], (0, 2, 3, 1))
            blk = blk.reshape(Cout, B, L * stride)
            blk = jnp.pad(blk, ((0, 0), (0, 0),
                                (q * stride, Lout - (q + L) * stride)))
            out = blk if out is None else out + blk
    else:
        out = jnp.zeros((Cout, B, Lout), jnp.float32)
        for k in range(K):
            out = out.at[:, :, k:k + (L - 1) * stride + 1:stride].add(y[:, k])
    out = out + b[:, None, None]
    if relu:
        out = jnp.maximum(out, 0.0)
    return out.astype(out_dtype)
    # TODO(synk): a dedicated Pallas epilogue could do the overlap-add
    # scatter-store directly from the matmul output tiles.


# ----------------------------------------------------------------------------
# Parameter init (deterministic, matches __init__ shapes + rescale_module)
# ----------------------------------------------------------------------------
def _rescale(w, b, reference):
    std = jnp.std(w, ddof=1)
    scale = jnp.sqrt(std / reference)
    return w / scale, b / scale


def init_params(key, cfg):
    chin, chout, hidden = cfg["chin"], cfg["chout"], cfg["hidden"]
    depth, K = cfg["depth"], cfg["kernel_size"]
    growth, max_hidden = cfg["growth"], cfg["max_hidden"]
    ch_scale = 2 if cfg["glu"] else 1
    ref = cfg["rescale"]
    kit = iter(jax.random.split(key, 8 * depth + 8))

    def uconv(cin, cout, k):   # torch Conv1d default init, weight (cout, cin, k)
        bound = 1.0 / math.sqrt(cin * k)
        w = jax.random.uniform(next(kit), (cout, cin, k), jnp.float32, -bound, bound)
        b = jax.random.uniform(next(kit), (cout,), jnp.float32, -bound, bound)
        return _rescale(w, b, ref) if ref else (w, b)

    def uconvT(cin, cout, k):  # torch ConvTranspose1d, weight (cin, cout, k)
        bound = 1.0 / math.sqrt(cout * k)
        w = jax.random.uniform(next(kit), (cin, cout, k), jnp.float32, -bound, bound)
        b = jax.random.uniform(next(kit), (cout,), jnp.float32, -bound, bound)
        return _rescale(w, b, ref) if ref else (w, b)

    encoder, decoder = [], []
    for _ in range(depth):
        w1, b1 = uconv(chin, hidden, K)
        w2, b2 = uconv(hidden, hidden * ch_scale, 1)
        encoder.append(dict(w1=w1, b1=b1, w2=w2, b2=b2))
        dw1, db1 = uconv(hidden, ch_scale * hidden, 1)
        dw2, db2 = uconvT(hidden, chout, K)
        decoder.insert(0, dict(w1=dw1, b1=db1, w2=dw2, b2=db2))
        chout = hidden
        chin = hidden
        hidden = min(int(growth * hidden), max_hidden)

    # causal=True -> unidirectional 2-layer LSTM, no Linear.
    # TODO(synk): causal=False (BiLSTM + Linear) path not implemented here.
    D = chin
    bound = 1.0 / math.sqrt(D)
    lstm = []
    for _ in range(2):
        lstm.append(dict(
            w_ih=jax.random.uniform(next(kit), (4 * D, D), jnp.float32, -bound, bound),
            w_hh=jax.random.uniform(next(kit), (4 * D, D), jnp.float32, -bound, bound),
            b_ih=jax.random.uniform(next(kit), (4 * D,), jnp.float32, -bound, bound),
            b_hh=jax.random.uniform(next(kit), (4 * D,), jnp.float32, -bound, bound),
        ))
    return dict(cfg=cfg, encoder=encoder, decoder=decoder, lstm=lstm)


# ----------------------------------------------------------------------------
# Forward pass
# ----------------------------------------------------------------------------
def valid_length(length, cfg):
    length = math.ceil(length * cfg["resample"])
    for _ in range(cfg["depth"]):
        length = math.ceil((length - cfg["kernel_size"]) / cfg["stride"]) + 1
        length = max(length, 1)
    for _ in range(cfg["depth"]):
        length = (length - 1) * cfg["stride"] + cfg["kernel_size"]
    length = int(math.ceil(length / cfg["resample"]))
    return int(length)


def demucs_forward(params, mix):
    cfg = params["cfg"]
    if mix.ndim == 2:
        mix = mix[:, None, :]                       # (B, 1, L)
    if cfg["normalize"]:
        mono = jnp.mean(mix, axis=1, keepdims=True)
        std = jnp.std(mono, axis=-1, keepdims=True, ddof=1)   # torch unbiased std
        mix = mix / (cfg["floor"] + std)
    else:
        std = 1.0
    length = mix.shape[-1]
    x = jnp.pad(mix, ((0, 0), (0, 0), (0, valid_length(length, cfg) - length)))

    if cfg["resample"] != 1:
        # TODO(synk): resample=2/4 needs sinc upsample2/downsample2 which are
        # not defined in the reference source; this script runs with resample=1.
        raise NotImplementedError("resample != 1 not supported in this script")

    # Channels-first working layout (C, B, L): length sits on the lane axis.
    x = jnp.transpose(x, (1, 0, 2))

    glu_act = "glu" if cfg["glu"] else "relu"
    skips = []
    # TODO(synk): fuse each (strided conv + ReLU, 1x1 GLU) encoder pair into a
    # single pallas_call to skip the intermediate HBM round-trip.
    for p in params["encoder"]:
        x = conv1d_cf(x, p["w1"], p["b1"], stride=cfg["stride"], act="relu")
        x = conv1d_cf(x, p["w2"], p["b2"], stride=1, act=glu_act)
        skips.append(x)

    # ---- LSTM section: time-major rows, single transpose in / out ----
    D, B_, T = x.shape
    xt = jnp.transpose(x, (2, 1, 0)).reshape(T * B_, D)
    for lp in params["lstm"]:
        xt = lstm_layer_tm(xt, lp["w_ih"], lp["w_hh"], lp["b_ih"], lp["b_hh"],
                           B=B_, T=T, out_dtype=ACT_DTYPE)
    x = jnp.transpose(xt.reshape(T, B_, D), (2, 1, 0))      # back to (D, B, T)

    n_dec = len(params["decoder"])
    for i, p in enumerate(params["decoder"]):
        skip = skips.pop(-1)[:, :, :x.shape[-1]]
        if glu_act == "glu":
            # skip-add fused into the 1x1 GLU kernel (x and skip read once).
            x = conv1d_cf(x, p["w1"], p["b1"], stride=1, act="glu", skip=skip)
        else:
            x = conv1d_cf(x + skip, p["w1"], p["b1"], stride=1, act="relu")
        last = (i == n_dec - 1)
        x = conv_transpose1d_cf(x, p["w2"], p["b2"], stride=cfg["stride"],
                                relu=not last,
                                out_dtype=(jnp.float32 if last else ACT_DTYPE))

    x = jnp.transpose(x, (1, 0, 2))                 # back to (B, C, L)
    x = x[..., :length]
    return (std * x).astype(jnp.float32)


# ----------------------------------------------------------------------------
if __name__ == "__main__":
    key = jax.random.PRNGKey(0)
    pkey, xkey = jax.random.split(key)
    cfg = dict(chin=1, chout=1, hidden=8, depth=2, kernel_size=8, stride=4,
               causal=True, resample=1, growth=2, max_hidden=10000,
               normalize=True, glu=True, rescale=0.1, floor=1e-3)
    params = init_params(pkey, cfg)

    # 2-D input (B, L) exercises the unsqueeze(1) branch; L=64 pads to valid_length=68.
    mix = jax.random.normal(xkey, (2, 64), dtype=jnp.float32)

    fwd = jax.jit(lambda m: demucs_forward(params, m))
    out = jax.block_until_ready(fwd(mix))
    assert out.shape == (2, 1, 64), out.shape
    assert bool(jnp.all(jnp.isfinite(out)))
    print("KERNEL_OK")
</pallas_src>

<mosaic_0001>
module attributes {stable_mosaic.version = 11 : i64} {
  func.func @_mm_kernel(%arg0: i32, %arg1: i32, %arg2: i32, %arg3: memref<16x16xbf16, #tpu.memory_space<vmem>>, %arg4: memref<16x128xbf16, #tpu.memory_space<vmem>>, %arg5: memref<16x1xf32, #tpu.memory_space<vmem>>, %arg6: memref<16x128xbf16, #tpu.memory_space<vmem>>, %arg7: memref<16x128xf32, #tpu.memory_space<vmem>>) attributes {dimension_semantics = [#tpu.dimension_semantics<parallel>, #tpu.dimension_semantics<parallel>, #tpu.dimension_semantics<arbitrary>], iteration_bounds = array<i64: 1, 1, 1>, scalar_prefetch = 0 : i64, scratch_operands = 1 : i64, tpu.core_type = #tpu.core_type<tc>, window_params = [{transform_indices = @transform_0, window_bounds = array<i64: 16, 16>}, {transform_indices = @transform_1, window_bounds = array<i64: 16, 128>}, {transform_indices = @transform_2, window_bounds = array<i64: 16, 1>}, {transform_indices = @transform_3, window_bounds = array<i64: 16, 128>}]} {
    %c0_i32 = arith.constant 0 : i32
    %0 = arith.cmpi eq, %arg2, %c0_i32 : i32
    %1 = arith.extui %0 : i1 to i32
    %c0_i32_0 = arith.constant 0 : i32
    %2 = arith.cmpi ne, %1, %c0_i32_0 : i32
    scf.if %2 {
      %c0_10 = arith.constant 0 : index
      %c0_11 = arith.constant 0 : index
      %12 = vector.load %arg5[%c0_10, %c0_11] : memref<16x1xf32, #tpu.memory_space<vmem>>, vector<16x1xf32>
      %cst_12 = arith.constant 0.000000e+00 : f32
      %13 = vector.broadcast %cst_12 : f32 to vector<16x128xf32>
      %14 = vector.broadcast %12 : vector<16x1xf32> to vector<16x128xf32>
      %15 = arith.addf %14, %13 : vector<16x128xf32>
      %c0_13 = arith.constant 0 : index
      %c0_14 = arith.constant 0 : index
      %16 = vector.load %arg7[%c0_13, %c0_14] : memref<16x128xf32, #tpu.memory_space<vmem>>, vector<16x128xf32>
      tpu.vector_store %arg7[%c0_13, %c0_14], %15 {strides = array<i32>} : memref<16x128xf32, #tpu.memory_space<vmem>>, vector<16x128xf32>,
    } else {
    }
    %c0 = arith.constant 0 : index
    %c0_1 = arith.constant 0 : index
    %3 = vector.load %arg7[%c0, %c0_1] : memref<16x128xf32, #tpu.memory_space<vmem>>, vector<16x128xf32>
    %c0_2 = arith.constant 0 : index
    %c0_3 = arith.constant 0 : index
    %4 = vector.load %arg3[%c0_2, %c0_3] : memref<16x16xbf16, #tpu.memory_space<vmem>>, vector<16x16xbf16>
    %c0_4 = arith.constant 0 : index
    %c0_5 = arith.constant 0 : index
    %5 = vector.load %arg4[%c0_4, %c0_5] : memref<16x128xbf16, #tpu.memory_space<vmem>>, vector<16x128xbf16>
    %cst = arith.constant dense<0.000000e+00> : vector<16x128xf32>
    %6 = tpu.matmul %4, %5, %cst {dimension_numbers = #tpu.dot_dimension_numbers<[1], [0], [0], [1], [0, 0, 1, 1], [], []>} : vector<16x16xbf16>, vector<16x128xbf16>, vector<16x128xf32> -> vector<16x128xf32>
    %7 = arith.addf %3, %6 : vector<16x128xf32>
    %c0_6 = arith.constant 0 : index
    %c0_7 = arith.constant 0 : index
    %8 = vector.load %arg7[%c0_6, %c0_7] : memref<16x128xf32, #tpu.memory_space<vmem>>, vector<16x128xf32>
    tpu.vector_store %arg7[%c0_6, %c0_7], %7 {strides = array<i32>} : memref<16x128xf32, #tpu.memory_space<vmem>>, vector<16x128xf32>,
    %c0_i32_8 = arith.constant 0 : i32
    %9 = arith.cmpi eq, %arg2, %c0_i32_8 : i32
    %10 = arith.extui %9 : i1 to i32
    %c0_i32_9 = arith.constant 0 : i32
    %11 = arith.cmpi ne, %10, %c0_i32_9 : i32
    scf.if %11 {
      %c0_10 = arith.constant 0 : index
      %c0_11 = arith.constant 0 : index
      %12 = vector.load %arg7[%c0_10, %c0_11] : memref<16x128xf32, #tpu.memory_space<vmem>>, vector<16x128xf32>
      %cst_12 = arith.constant 0.000000e+00 : f32
      %13 = vector.broadcast %cst_12 : f32 to vector<16x128xf32>
      %14 = arith.maximumf %12, %13 : vector<16x128xf32>
      %15 = arith.truncf %14 : vector<16x128xf32> to vector<16x128xbf16>
      %c0_13 = arith.constant 0 : index
      %c0_14 = arith.constant 0 : index
      %16 = vector.load %arg6[%c0_13, %c0_14] : memref<16x128xbf16, #tpu.memory_space<vmem>>, vector<16x128xbf16>
      tpu.vector_store %arg6[%c0_13, %c0_14], %15 {strides = array<i32>} : memref<16x128xbf16, #tpu.memory_space<vmem>>, vector<16x128xbf16>,
    } else {
    }
    return
  }
  func.func @transform_0(%arg0: i32, %arg1: i32, %arg2: i32) -> (i32, i32) {
    %c0_i32 = arith.constant 0 : i32
    return %arg0, %arg2 : i32, i32
  }
  func.func @transform_1(%arg0: i32, %arg1: i32, %arg2: i32) -> (i32, i32) {
    %c0_i32 = arith.constant 0 : i32
    return %arg2, %arg1 : i32, i32
  }
  func.func @transform_2(%arg0: i32, %arg1: i32, %arg2: i32) -> (i32, i32) {
    %c0_i32 = arith.constant 0 : i32
    %c0_i32_0 = arith.constant 0 : i32
    return %arg0, %c0_i32 : i32, i32
  }
  func.func @transform_3(%arg0: i32, %arg1: i32, %arg2: i32) -> (i32, i32) {
    %c0_i32 = arith.constant 0 : i32
    return %arg0, %arg1 : i32, i32
  }
}

module attributes {stable_mosaic.version = 11 : i64} {
  func.func @_mm_glu_kernel(%arg0: i32, %arg1: i32, %arg2: i32, %arg3: memref<32x16xbf16, #tpu.memory_space<vmem>>, %arg4: memref<16x128xbf16, #tpu.memory_space<vmem>>, %arg5: memref<32x1xf32, #tpu.memory_space<vmem>>, %arg6: memref<16x128xbf16, #tpu.memory_space<vmem>>, %arg7: memref<32x128xf32, #tpu.memory_space<vmem>>) attributes {dimension_semantics = [#tpu.dimension_semantics<parallel>, #tpu.dimension_semantics<parallel>, #tpu.dimension_semantics<arbitrary>], iteration_bounds = array<i64: 1, 1, 1>, scalar_prefetch = 0 : i64, scratch_operands = 1 : i64, tpu.core_type = #tpu.core_type<tc>, window_params = [{transform_indices = @transform_0, window_bounds = array<i64: 32, 16>}, {transform_indices = @transform_1, window_bounds = array<i64: 16, 128>}, {transform_indices = @transform_2, window_bounds = array<i64: 32, 1>}, {transform_indices = @transform_3, window_bounds = array<i64: 16, 128>}]} {
    %c0_i32 = arith.constant 0 : i32
    %0 = arith.cmpi eq, %arg2, %c0_i32 : i32
    %1 = arith.extui %0 : i1 to i32
    %c0_i32_0 = arith.constant 0 : i32
    %2 = arith.cmpi ne, %1, %c0_i32_0 : i32
    scf.if %2 {
      %c0_10 = arith.constant 0 : index
      %c0_11 = arith.constant 0 : index
      %12 = vector.load %arg5[%c0_10, %c0_11] : memref<32x1xf32, #tpu.memory_space<vmem>>, vector<32x1xf32>
      %cst_12 = arith.constant 0.000000e+00 : f32
      %13 = vector.broadcast %cst_12 : f32 to vector<32x128xf32>
      %14 = vector.broadcast %12 : vector<32x1xf32> to vector<32x128xf32>
      %15 = arith.addf %14, %13 : vector<32x128xf32>
      %c0_13 = arith.constant 0 : index
      %c0_14 = arith.constant 0 : index
      %16 = vector.load %arg7[%c0_13, %c0_14] : memref<32x128xf32, #tpu.memory_space<vmem>>, vector<32x128xf32>
      tpu.vector_store %arg7[%c0_13, %c0_14], %15 {strides = array<i32>} : memref<32x128xf32, #tpu.memory_space<vmem>>, vector<32x128xf32>,
    } else {
    }
    %c0 = arith.constant 0 : index
    %c0_1 = arith.constant 0 : index
    %3 = vector.load %arg4[%c0, %c0_1] : memref<16x128xbf16, #tpu.memory_space<vmem>>, vector<16x128xbf16>
    %c0_2 = arith.constant 0 : index
    %c0_3 = arith.constant 0 : index
    %4 = vector.load %arg7[%c0_2, %c0_3] : memref<32x128xf32, #tpu.memory_space<vmem>>, vector<32x128xf32>
    %c0_4 = arith.constant 0 : index
    %c0_5 = arith.constant 0 : index
    %5 = vector.load %arg3[%c0_4, %c0_5] : memref<32x16xbf16, #tpu.memory_space<vmem>>, vector<32x16xbf16>
    %cst = arith.constant dense<0.000000e+00> : vector<32x128xf32>
    %6 = tpu.matmul %5, %3, %cst {dimension_numbers = #tpu.dot_dimension_numbers<[1], [0], [0], [1], [0, 0, 1, 1], [], []>} : vector<32x16xbf16>, vector<16x128xbf16>, vector<32x128xf32> -> vector<32x128xf32>
    %7 = arith.addf %4, %6 : vector<32x128xf32>
    %c0_6 = arith.constant 0 : index
    %c0_7 = arith.constant 0 : index
    %8 = vector.load %arg7[%c0_6, %c0_7] : memref<32x128xf32, #tpu.memory_space<vmem>>, vector<32x128xf32>
    tpu.vector_store %arg7[%c0_6, %c0_7], %7 {strides = array<i32>} : memref<32x128xf32, #tpu.memory_space<vmem>>, vector<32x128xf32>,
    %c0_i32_8 = arith.constant 0 : i32
    %9 = arith.cmpi eq, %arg2, %c0_i32_8 : i32
    %10 = arith.extui %9 : i1 to i32
    %c0_i32_9 = arith.constant 0 : i32
    %11 = arith.cmpi ne, %10, %c0_i32_9 : i32
    scf.if %11 {
      %c0_10 = arith.constant 0 : index
      %c0_11 = arith.constant 0 : index
      %12 = vector.load %arg7[%c0_10, %c0_11] : memref<32x128xf32, #tpu.memory_space<vmem>>, vector<16x128xf32>
      %c16 = arith.constant 16 : index
      %c0_12 = arith.constant 0 : index
      %13 = vector.load %arg7[%c16, %c0_12] : memref<32x128xf32, #tpu.memory_space<vmem>>, vector<16x128xf32>
      %14 = arith.negf %13 : vector<16x128xf32>
      %15 = math.exp %14 : vector<16x128xf32>
      %cst_13 = arith.constant 1.000000e+00 : f32
      %16 = vector.broadcast %cst_13 : f32 to vector<16x128xf32>
      %17 = arith.addf %16, %15 : vector<16x128xf32>
      %18 = arith.divf %16, %17 : vector<16x128xf32>
      %19 = arith.mulf %12, %18 : vector<16x128xf32>
      %20 = arith.truncf %19 : vector<16x128xf32> to vector<16x128xbf16>
      %c0_14 = arith.constant 0 : index
      %c0_15 = arith.constant 0 : index
      %21 = vector.load %arg6[%c0_14, %c0_15] : memref<16x128xbf16, #tpu.memory_space<vmem>>, vector<16x128xbf16>
      tpu.vector_store %arg6[%c0_14, %c0_15], %20 {strides = array<i32>} : memref<16x128xbf16, #tpu.memory_space<vmem>>, vector<16x128xbf16>,
    } else {
    }
    return
  }
  func.func @transform_0(%arg0: i32, %arg1: i32, %arg2: i32) -> (i32, i32) {
    %c0_i32 = arith.constant 0 : i32
    return %arg0, %arg2 : i32, i32
  }
  func.func @transform_1(%arg0: i32, %arg1: i32, %arg2: i32) -> (i32, i32) {
    %c0_i32 = arith.constant 0 : i32
    return %arg2, %arg1 : i32, i32
  }
  func.func @transform_2(%arg0: i32, %arg1: i32, %arg2: i32) -> (i32, i32) {
    %c0_i32 = arith.constant 0 : i32
    %c0_i32_0 = arith.constant 0 : i32
    return %arg0, %c0_i32 : i32, i32
  }
  func.func @transform_3(%arg0: i32, %arg1: i32, %arg2: i32) -> (i32, i32) {
    %c0_i32 = arith.constant 0 : i32
    return %arg0, %arg1 : i32, i32
  }
}

module attributes {stable_mosaic.version = 11 : i64} {
  func.func @_mm_kernel(%arg0: i32, %arg1: i32, %arg2: i32, %arg3: memref<16x64xbf16, #tpu.memory_space<vmem>>, %arg4: memref<64x128xbf16, #tpu.memory_space<vmem>>, %arg5: memref<16x1xf32, #tpu.memory_space<vmem>>, %arg6: memref<16x128xbf16, #tpu.memory_space<vmem>>, %arg7: memref<16x128xf32, #tpu.memory_space<vmem>>) attributes {dimension_semantics = [#tpu.dimension_semantics<parallel>, #tpu.dimension_semantics<parallel>, #tpu.dimension_semantics<arbitrary>], iteration_bounds = array<i64: 1, 1, 1>, scalar_prefetch = 0 : i64, scratch_operands = 1 : i64, tpu.core_type = #tpu.core_type<tc>, window_params = [{transform_indices = @transform_0, window_bounds = array<i64: 16, 64>}, {transform_indices = @transform_1, window_bounds = array<i64: 64, 128>}, {transform_indices = @transform_2, window_bounds = array<i64: 16, 1>}, {transform_indices = @transform_3, window_bounds = array<i64: 16, 128>}]} {
    %c0_i32 = arith.constant 0 : i32
    %0 = arith.cmpi eq, %arg2, %c0_i32 : i32
    %1 = arith.extui %0 : i1 to i32
    %c0_i32_0 = arith.constant 0 : i32
    %2 = arith.cmpi ne, %1, %c0_i32_0 : i32
    scf.if %2 {
      %c0_10 = arith.constant 0 : index
      %c0_11 = arith.constant 0 : index
      %12 = vector.load %arg5[%c0_10, %c0_11] : memref<16x1xf32, #tpu.memory_space<vmem>>, vector<16x1xf32>
      %cst_12 = arith.constant 0.000000e+00 : f32
      %13 = vector.broadcast %cst_12 : f32 to vector<16x128xf32>
      %14 = vector.broadcast %12 : vector<16x1xf32> to vector<16x128xf32>
      %15 = arith.addf %14, %13 : vector<16x128xf32>
      %c0_13 = arith.constant 0 : index
      %c0_14 = arith.constant 0 : index
      %16 = vector.load %arg7[%c0_13, %c0_14] : memref<16x128xf32, #tpu.memory_space<vmem>>, vector<16x128xf32>
      tpu.vector_store %arg7[%c0_13, %c0_14], %15 {strides = array<i32>} : memref<16x128xf32, #tpu.memory_space<vmem>>, vector<16x128xf32>,
    } else {
    }
    %c0 = arith.constant 0 : index
    %c0_1 = arith.constant 0 : index
    %3 = vector.load %arg7[%c0, %c0_1] : memref<16x128xf32, #tpu.memory_space<vmem>>, vector<16x128xf32>
    %c0_2 = arith.constant 0 : index
    %c0_3 = arith.constant 0 : index
    %4 = vector.load %arg3[%c0_2, %c0_3] : memref<16x64xbf16, #tpu.memory_space<vmem>>, vector<16x64xbf16>
    %c0_4 = arith.constant 0 : index
    %c0_5 = arith.constant 0 : index
    %5 = vector.load %arg4[%c0_4, %c0_5] : memref<64x128xbf16, #tpu.memory_space<vmem>>, vector<64x128xbf16>
    %cst = arith.constant dense<0.000000e+00> : vector<16x128xf32>
    %6 = tpu.matmul %4, %5, %cst {dimension_numbers = #tpu.dot_dimension_numbers<[1], [0], [0], [1], [0, 0, 1, 1], [], []>} : vector<16x64xbf16>, vector<64x128xbf16>, vector<16x128xf32> -> vector<16x128xf32>
    %7 = arith.addf %3, %6 : vector<16x128xf32>
    %c0_6 = arith.constant 0 : index
    %c0_7 = arith.constant 0 : index
    %8 = vector.load %arg7[%c0_6, %c0_7] : memref<16x128xf32, #tpu.memory_space<vmem>>, vector<16x128xf32>
    tpu.vector_store %arg7[%c0_6, %c0_7], %7 {strides = array<i32>} : memref<16x128xf32, #tpu.memory_space<vmem>>, vector<16x128xf32>,
    %c0_i32_8 = arith.constant 0 : i32
    %9 = arith.cmpi eq, %arg2, %c0_i32_8 : i32
    %10 = arith.extui %9 : i1 to i32
    %c0_i32_9 = arith.constant 0 : i32
    %11 = arith.cmpi ne, %10, %c0_i32_9 : i32
    scf.if %11 {
      %c0_10 = arith.constant 0 : index
      %c0_11 = arith.constant 0 : index
      %12 = vector.load %arg7[%c0_10, %c0_11] : memref<16x128xf32, #tpu.memory_space<vmem>>, vector<16x128xf32>
      %cst_12 = arith.constant 0.000000e+00 : f32
      %13 = vector.broadcast %cst_12 : f32 to vector<16x128xf32>
      %14 = arith.maximumf %12, %13 : vector<16x128xf32>
      %15 = arith.truncf %14 : vector<16x128xf32> to vector<16x128xbf16>
      %c0_13 = arith.constant 0 : index
      %c0_14 = arith.constant 0 : index
      %16 = vector.load %arg6[%c0_13, %c0_14] : memref<16x128xbf16, #tpu.memory_space<vmem>>, vector<16x128xbf16>
      tpu.vector_store %arg6[%c0_13, %c0_14], %15 {strides = array<i32>} : memref<16x128xbf16, #tpu.memory_space<vmem>>, vector<16x128xbf16>,
    } else {
    }
    return
  }
  func.func @transform_0(%arg0: i32, %arg1: i32, %arg2: i32) -> (i32, i32) {
    %c0_i32 = arith.constant 0 : i32
    return %arg0, %arg2 : i32, i32
  }
  func.func @transform_1(%arg0: i32, %arg1: i32, %arg2: i32) -> (i32, i32) {
    %c0_i32 = arith.constant 0 : i32
    return %arg2, %arg1 : i32, i32
  }
  func.func @transform_2(%arg0: i32, %arg1: i32, %arg2: i32) -> (i32, i32) {
    %c0_i32 = arith.constant 0 : i32
    %c0_i32_0 = arith.constant 0 : i32
    return %arg0, %c0_i32 : i32, i32
  }
  func.func @transform_3(%arg0: i32, %arg1: i32, %arg2: i32) -> (i32, i32) {
    %c0_i32 = arith.constant 0 : i32
    return %arg0, %arg1 : i32, i32
  }
}

module attributes {stable_mosaic.version = 11 : i64} {
  func.func @_lstm_rec_kernel(%arg0: i32, %arg1: memref<3x2x64xf32, #tpu.memory_space<vmem>>, %arg2: memref<16x64xbf16, #tpu.memory_space<vmem>>, %arg3: memref<3x2x16xbf16, #tpu.memory_space<vmem>>, %arg4: memref<2x16xf32, #tpu.memory_space<vmem>>, %arg5: memref<2x16xf32, #tpu.memory_space<vmem>>) attributes {dimension_semantics = [#tpu.dimension_semantics<arbitrary>], iteration_bounds = array<i64: 1>, scalar_prefetch = 0 : i64, scratch_operands = 2 : i64, tpu.core_type = #tpu.core_type<tc>, window_params = [{transform_indices = @transform_0, window_bounds = array<i64: 3, 2, 64>}, {pipeline_mode = #tpu.pipeline_mode<synchronous>, transform_indices = @transform_1, window_bounds = array<i64: 16, 64>}, {transform_indices = @transform_2, window_bounds = array<i64: 3, 2, 16>}]} {
    %c0_i32 = arith.constant 0 : i32
    %0 = arith.cmpi eq, %arg0, %c0_i32 : i32
    %1 = arith.extui %0 : i1 to i32
    %c0_i32_0 = arith.constant 0 : i32
    %2 = arith.cmpi ne, %1, %c0_i32_0 : i32
    scf.if %2 {
      %cst = arith.constant 0.000000e+00 : f32
      %4 = vector.broadcast %cst : f32 to vector<2x16xf32>
      %c0 = arith.constant 0 : index
      %c0_3 = arith.constant 0 : index
      %5 = vector.load %arg4[%c0, %c0_3] : memref<2x16xf32, #tpu.memory_space<vmem>>, vector<2x16xf32>
      tpu.vector_store %arg4[%c0, %c0_3], %4 {strides = array<i32>} : memref<2x16xf32, #tpu.memory_space<vmem>>, vector<2x16xf32>,
      %cst_4 = arith.constant 0.000000e+00 : f32
      %6 = vector.broadcast %cst_4 : f32 to vector<2x16xf32>
      %c0_5 = arith.constant 0 : index
      %c0_6 = arith.constant 0 : index
      %7 = vector.load %arg5[%c0_5, %c0_6] : memref<2x16xf32, #tpu.memory_space<vmem>>, vector<2x16xf32>
      tpu.vector_store %arg5[%c0_5, %c0_6], %6 {strides = array<i32>} : memref<2x16xf32, #tpu.memory_space<vmem>>, vector<2x16xf32>,
    } else {
    }
    %c0_i32_1 = arith.constant 0 : i32
    %c3_i32 = arith.constant 3 : i32
    %3 = arith.addi %c0_i32_1, %c3_i32 : i32
    %c1_i32 = arith.constant 1 : i32
    scf.for %arg6 = %c0_i32_1 to %3 step %c1_i32  : i32 {
      %4 = arith.index_cast %arg6 : i32 to index
      %c0 = arith.constant 0 : index
      %c0_3 = arith.constant 0 : index
      %5 = vector.load %arg1[%4, %c0, %c0_3] : memref<3x2x64xf32, #tpu.memory_space<vmem>>, vector<1x2x64xf32>
      %6 = vector.shape_cast %5 : vector<1x2x64xf32> to vector<2x64xf32>
      %c0_4 = arith.constant 0 : index
      %c0_5 = arith.constant 0 : index
      %7 = vector.load %arg4[%c0_4, %c0_5] : memref<2x16xf32, #tpu.memory_space<vmem>>, vector<2x16xf32>
      %8 = arith.truncf %7 : vector<2x16xf32> to vector<2x16xbf16>
      %c0_6 = arith.constant 0 : index
      %c0_7 = arith.constant 0 : index
      %9 = vector.load %arg2[%c0_6, %c0_7] : memref<16x64xbf16, #tpu.memory_space<vmem>>, vector<16x64xbf16>
      %cst = arith.constant dense<0.000000e+00> : vector<2x64xf32>
      %10 = tpu.matmul %8, %9, %cst {dimension_numbers = #tpu.dot_dimension_numbers<[1], [0], [0], [1], [0, 0, 1, 1], [], []>} : vector<2x16xbf16>, vector<16x64xbf16>, vector<2x64xf32> -> vector<2x64xf32>
      %11 = arith.addf %6, %10 : vector<2x64xf32>
      %12 = vector.extract_strided_slice %11 {offsets = [0, 0], sizes = [2, 48], strides = [1, 1]} : vector<2x64xf32> to vector<2x48xf32>
      %13 = arith.negf %12 : vector<2x48xf32>
      %14 = math.exp %13 : vector<2x48xf32>
      %cst_8 = arith.constant 1.000000e+00 : f32
      %15 = vector.broadcast %cst_8 : f32 to vector<2x48xf32>
      %16 = arith.addf %15, %14 : vector<2x48xf32>
      %17 = arith.divf %15, %16 : vector<2x48xf32>
      %18 = vector.extract_strided_slice %17 {offsets = [0, 0], sizes = [2, 16], strides = [1, 1]} : vector<2x48xf32> to vector<2x16xf32>
      %19 = vector.extract_strided_slice %17 {offsets = [0, 16], sizes = [2, 16], strides = [1, 1]} : vector<2x48xf32> to vector<2x16xf32>
      %20 = vector.extract_strided_slice %17 {offsets = [0, 32], sizes = [2, 16], strides = [1, 1]} : vector<2x48xf32> to vector<2x16xf32>
      %21 = vector.extract_strided_slice %11 {offsets = [0, 48], sizes = [2, 16], strides = [1, 1]} : vector<2x64xf32> to vector<2x16xf32>
      %22 = math.tanh %21 : vector<2x16xf32>
      %c0_9 = arith.constant 0 : index
      %c0_10 = arith.constant 0 : index
      %23 = vector.load %arg5[%c0_9, %c0_10] : memref<2x16xf32, #tpu.memory_space<vmem>>, vector<2x16xf32>
      %24 = arith.mulf %19, %23 : vector<2x16xf32>
      %25 = arith.mulf %18, %22 : vector<2x16xf32>
      %26 = arith.addf %24, %25 : vector<2x16xf32>
      %27 = math.tanh %26 : vector<2x16xf32>
      %28 = arith.mulf %20, %27 : vector<2x16xf32>
      %c0_11 = arith.constant 0 : index
      %c0_12 = arith.constant 0 : index
      %29 = vector.load %arg5[%c0_11, %c0_12] : memref<2x16xf32, #tpu.memory_space<vmem>>, vector<2x16xf32>
      tpu.vector_store %arg5[%c0_11, %c0_12], %26 {strides = array<i32>} : memref<2x16xf32, #tpu.memory_space<vmem>>, vector<2x16xf32>,
      %c0_13 = arith.constant 0 : index
      %c0_14 = arith.constant 0 : index
      %30 = vector.load %arg4[%c0_13, %c0_14] : memref<2x16xf32, #tpu.memory_space<vmem>>, vector<2x16xf32>
      tpu.vector_store %arg4[%c0_13, %c0_14], %28 {strides = array<i32>} : memref<2x16xf32, #tpu.memory_space<vmem>>, vector<2x16xf32>,
      %31 = arith.truncf %28 : vector<2x16xf32> to vector<2x16xbf16>
      %32 = arith.index_cast %arg6 : i32 to index
      %c0_15 = arith.constant 0 : index
      %c0_16 = arith.constant 0 : index
      %33 = vector.load %arg3[%32, %c0_15, %c0_16] : memref<3x2x16xbf16, #tpu.memory_space<vmem>>, vector<1x2x16xbf16>
      %34 = vector.shape_cast %33 : vector<1x2x16xbf16> to vector<2x16xbf16>
      %35 = vector.shape_cast %31 : vector<2x16xbf16> to vector<1x2x16xbf16>
      tpu.vector_store %arg3[%32, %c0_15, %c0_16], %35 {strides = array<i32>} : memref<3x2x16xbf16, #tpu.memory_space<vmem>>, vector<1x2x16xbf16>,
    }
    %c3_i32_2 = arith.constant 3 : i32
    return
  }
  func.func @transform_0(%arg0: i32) -> (i32, i32, i32) {
    %c0_i32 = arith.constant 0 : i32
    %c0_i32_0 = arith.constant 0 : i32
    %c0_i32_1 = arith.constant 0 : i32
    return %arg0, %c0_i32, %c0_i32_0 : i32, i32, i32
  }
  func.func @transform_1(%arg0: i32) -> (i32, i32) {
    %c0_i32 = arith.constant 0 : i32
    %c0_i32_0 = arith.constant 0 : i32
    %c0_i32_1 = arith.constant 0 : i32
    return %c0_i32, %c0_i32_0 : i32, i32
  }
  func.func @transform_2(%arg0: i32) -> (i32, i32, i32) {
    %c0_i32 = arith.constant 0 : i32
    %c0_i32_0 = arith.constant 0 : i32
    %c0_i32_1 = arith.constant 0 : i32
    return %arg0, %c0_i32, %c0_i32_0 : i32, i32, i32
  }
}

module attributes {stable_mosaic.version = 11 : i64} {
  func.func @_mm_kernel(%arg0: i32, %arg1: i32, %arg2: i32, %arg3: memref<16x16xbf16, #tpu.memory_space<vmem>>, %arg4: memref<16x128xbf16, #tpu.memory_space<vmem>>, %arg5: memref<1x128xf32, #tpu.memory_space<vmem>>, %arg6: memref<16x128xf32, #tpu.memory_space<vmem>>, %arg7: memref<16x128xf32, #tpu.memory_space<vmem>>) attributes {dimension_semantics = [#tpu.dimension_semantics<parallel>, #tpu.dimension_semantics<parallel>, #tpu.dimension_semantics<arbitrary>], iteration_bounds = array<i64: 1, 1, 1>, scalar_prefetch = 0 : i64, scratch_operands = 1 : i64, tpu.core_type = #tpu.core_type<tc>, window_params = [{transform_indices = @transform_0, window_bounds = array<i64: 16, 16>}, {transform_indices = @transform_1, window_bounds = array<i64: 16, 128>}, {transform_indices = @transform_2, window_bounds = array<i64: 1, 128>}, {transform_indices = @transform_3, window_bounds = array<i64: 16, 128>}]} {
    %c0_i32 = arith.constant 0 : i32
    %0 = arith.cmpi eq, %arg2, %c0_i32 : i32
    %1 = arith.extui %0 : i1 to i32
    %c0_i32_0 = arith.constant 0 : i32
    %2 = arith.cmpi ne, %1, %c0_i32_0 : i32
    scf.if %2 {
      %c0_10 = arith.constant 0 : index
      %c0_11 = arith.constant 0 : index
      %12 = vector.load %arg5[%c0_10, %c0_11] : memref<1x128xf32, #tpu.memory_space<vmem>>, vector<1x128xf32>
      %cst_12 = arith.constant 0.000000e+00 : f32
      %13 = vector.broadcast %cst_12 : f32 to vector<16x128xf32>
      %14 = vector.broadcast %12 : vector<1x128xf32> to vector<16x128xf32>
      %15 = arith.addf %14, %13 : vector<16x128xf32>
      %c0_13 = arith.constant 0 : index
      %c0_14 = arith.constant 0 : index
      %16 = vector.load %arg7[%c0_13, %c0_14] : memref<16x128xf32, #tpu.memory_space<vmem>>, vector<16x128xf32>
      tpu.vector_store %arg7[%c0_13, %c0_14], %15 {strides = array<i32>} : memref<16x128xf32, #tpu.memory_space<vmem>>, vector<16x128xf32>,
    } else {
    }
    %c0 = arith.constant 0 : index
    %c0_1 = arith.constant 0 : index
    %3 = vector.load %arg7[%c0, %c0_1] : memref<16x128xf32, #tpu.memory_space<vmem>>, vector<16x128xf32>
    %c0_2 = arith.constant 0 : index
    %c0_3 = arith.constant 0 : index
    %4 = vector.load %arg3[%c0_2, %c0_3] : memref<16x16xbf16, #tpu.memory_space<vmem>>, vector<16x16xbf16>
    %c0_4 = arith.constant 0 : index
    %c0_5 = arith.constant 0 : index
    %5 = vector.load %arg4[%c0_4, %c0_5] : memref<16x128xbf16, #tpu.memory_space<vmem>>, vector<16x128xbf16>
    %cst = arith.constant dense<0.000000e+00> : vector<16x128xf32>
    %6 = tpu.matmul %4, %5, %cst {dimension_numbers = #tpu.dot_dimension_numbers<[1], [0], [0], [1], [0, 0, 1, 1], [], []>} : vector<16x16xbf16>, vector<16x128xbf16>, vector<16x128xf32> -> vector<16x128xf32>
    %7 = arith.addf %3, %6 : vector<16x128xf32>
    %c0_6 = arith.constant 0 : index
    %c0_7 = arith.constant 0 : index
    %8 = vector.load %arg7[%c0_6, %c0_7] : memref<16x128xf32, #tpu.memory_space<vmem>>, vector<16x128xf32>
    tpu.vector_store %arg7[%c0_6, %c0_7], %7 {strides = array<i32>} : memref<16x128xf32, #tpu.memory_space<vmem>>, vector<16x128xf32>,
    %c0_i32_8 = arith.constant 0 : i32
    %9 = arith.cmpi eq, %arg2, %c0_i32_8 : i32
    %10 = arith.extui %9 : i1 to i32
    %c0_i32_9 = arith.constant 0 : i32
    %11 = arith.cmpi ne, %10, %c0_i32_9 : i32
    scf.if %11 {
      %c0_10 = arith.constant 0 : index
      %c0_11 = arith.constant 0 : index
      %12 = vector.load %arg7[%c0_10, %c0_11] : memref<16x128xf32, #tpu.memory_space<vmem>>, vector<16x128xf32>
      %c0_12 = arith.constant 0 : index
      %c0_13 = arith.constant 0 : index
      %13 = vector.load %arg6[%c0_12, %c0_13] : memref<16x128xf32, #tpu.memory_space<vmem>>, vector<16x128xf32>
      tpu.vector_store %arg6[%c0_12, %c0_13], %12 {strides = array<i32>} : memref<16x128xf32, #tpu.memory_space<vmem>>, vector<16x128xf32>,
    } else {
    }
    return
  }
  func.func @transform_0(%arg0: i32, %arg1: i32, %arg2: i32) -> (i32, i32) {
    %c0_i32 = arith.constant 0 : i32
    return %arg0, %arg2 : i32, i32
  }
  func.func @transform_1(%arg0: i32, %arg1: i32, %arg2: i32) -> (i32, i32) {
    %c0_i32 = arith.constant 0 : i32
    return %arg2, %arg1 : i32, i32
  }
  func.func @transform_2(%arg0: i32, %arg1: i32, %arg2: i32) -> (i32, i32) {
    %c0_i32 = arith.constant 0 : i32
    %c0_i32_0 = arith.constant 0 : i32
    return %c0_i32, %arg1 : i32, i32
  }
  func.func @transform_3(%arg0: i32, %arg1: i32, %arg2: i32) -> (i32, i32) {
    %c0_i32 = arith.constant 0 : i32
    return %arg0, %arg1 : i32, i32
  }
}

module attributes {stable_mosaic.version = 11 : i64} {
  func.func @_mm_glu_kernel(%arg0: i32, %arg1: i32, %arg2: i32, %arg3: memref<32x16xbf16, #tpu.memory_space<vmem>>, %arg4: memref<16x128xbf16, #tpu.memory_space<vmem>>, %arg5: memref<16x128xbf16, #tpu.memory_space<vmem>>, %arg6: memref<32x1xf32, #tpu.memory_space<vmem>>, %arg7: memref<16x128xbf16, #tpu.memory_space<vmem>>, %arg8: memref<32x128xf32, #tpu.memory_space<vmem>>) attributes {dimension_semantics = [#tpu.dimension_semantics<parallel>, #tpu.dimension_semantics<parallel>, #tpu.dimension_semantics<arbitrary>], iteration_bounds = array<i64: 1, 1, 1>, scalar_prefetch = 0 : i64, scratch_operands = 1 : i64, tpu.core_type = #tpu.core_type<tc>, window_params = [{transform_indices = @transform_0, window_bounds = array<i64: 32, 16>}, {transform_indices = @transform_1, window_bounds = array<i64: 16, 128>}, {transform_indices = @transform_2, window_bounds = array<i64: 16, 128>}, {transform_indices = @transform_3, window_bounds = array<i64: 32, 1>}, {transform_indices = @transform_4, window_bounds = array<i64: 16, 128>}]} {
    %c0_i32 = arith.constant 0 : i32
    %0 = arith.cmpi eq, %arg2, %c0_i32 : i32
    %1 = arith.extui %0 : i1 to i32
    %c0_i32_0 = arith.constant 0 : i32
    %2 = arith.cmpi ne, %1, %c0_i32_0 : i32
    scf.if %2 {
      %c0_12 = arith.constant 0 : index
      %c0_13 = arith.constant 0 : index
      %14 = vector.load %arg6[%c0_12, %c0_13] : memref<32x1xf32, #tpu.memory_space<vmem>>, vector<32x1xf32>
      %cst_14 = arith.constant 0.000000e+00 : f32
      %15 = vector.broadcast %cst_14 : f32 to vector<32x128xf32>
      %16 = vector.broadcast %14 : vector<32x1xf32> to vector<32x128xf32>
      %17 = arith.addf %16, %15 : vector<32x128xf32>
      %c0_15 = arith.constant 0 : index
      %c0_16 = arith.constant 0 : index
      %18 = vector.load %arg8[%c0_15, %c0_16] : memref<32x128xf32, #tpu.memory_space<vmem>>, vector<32x128xf32>
      tpu.vector_store %arg8[%c0_15, %c0_16], %17 {strides = array<i32>} : memref<32x128xf32, #tpu.memory_space<vmem>>, vector<32x128xf32>,
    } else {
    }
    %c0 = arith.constant 0 : index
    %c0_1 = arith.constant 0 : index
    %3 = vector.load %arg4[%c0, %c0_1] : memref<16x128xbf16, #tpu.memory_space<vmem>>, vector<16x128xbf16>
    %c0_2 = arith.constant 0 : index
    %c0_3 = arith.constant 0 : index
    %4 = vector.load %arg5[%c0_2, %c0_3] : memref<16x128xbf16, #tpu.memory_space<vmem>>, vector<16x128xbf16>
    %5 = arith.addf %3, %4 : vector<16x128xbf16>
    %c0_4 = arith.constant 0 : index
    %c0_5 = arith.constant 0 : index
    %6 = vector.load %arg8[%c0_4, %c0_5] : memref<32x128xf32, #tpu.memory_space<vmem>>, vector<32x128xf32>
    %c0_6 = arith.constant 0 : index
    %c0_7 = arith.constant 0 : index
    %7 = vector.load %arg3[%c0_6, %c0_7] : memref<32x16xbf16, #tpu.memory_space<vmem>>, vector<32x16xbf16>
    %cst = arith.constant dense<0.000000e+00> : vector<32x128xf32>
    %8 = tpu.matmul %7, %5, %cst {dimension_numbers = #tpu.dot_dimension_numbers<[1], [0], [0], [1], [0, 0, 1, 1], [], []>} : vector<32x16xbf16>, vector<16x128xbf16>, vector<32x128xf32> -> vector<32x128xf32>
    %9 = arith.addf %6, %8 : vector<32x128xf32>
    %c0_8 = arith.constant 0 : index
    %c0_9 = arith.constant 0 : index
    %10 = vector.load %arg8[%c0_8, %c0_9] : memref<32x128xf32, #tpu.memory_space<vmem>>, vector<32x128xf32>
    tpu.vector_store %arg8[%c0_8, %c0_9], %9 {strides = array<i32>} : memref<32x128xf32, #tpu.memory_space<vmem>>, vector<32x128xf32>,
    %c0_i32_10 = arith.constant 0 : i32
    %11 = arith.cmpi eq, %arg2, %c0_i32_10 : i32
    %12 = arith.extui %11 : i1 to i32
    %c0_i32_11 = arith.constant 0 : i32
    %13 = arith.cmpi ne, %12, %c0_i32_11 : i32
    scf.if %13 {
      %c0_12 = arith.constant 0 : index
      %c0_13 = arith.constant 0 : index
      %14 = vector.load %arg8[%c0_12, %c0_13] : memref<32x128xf32, #tpu.memory_space<vmem>>, vector<16x128xf32>
      %c16 = arith.constant 16 : index
      %c0_14 = arith.constant 0 : index
      %15 = vector.load %arg8[%c16, %c0_14] : memref<32x128xf32, #tpu.memory_space<vmem>>, vector<16x128xf32>
      %16 = arith.negf %15 : vector<16x128xf32>
      %17 = math.exp %16 : vector<16x128xf32>
      %cst_15 = arith.constant 1.000000e+00 : f32
      %18 = vector.broadcast %cst_15 : f32 to vector<16x128xf32>
      %19 = arith.addf %18, %17 : vector<16x128xf32>
      %20 = arith.divf %18, %19 : vector<16x128xf32>
      %21 = arith.mulf %14, %20 : vector<16x128xf32>
      %22 = arith.truncf %21 : vector<16x128xf32> to vector<16x128xbf16>
      %c0_16 = arith.constant 0 : index
      %c0_17 = arith.constant 0 : index
      %23 = vector.load %arg7[%c0_16, %c0_17] : memref<16x128xbf16, #tpu.memory_space<vmem>>, vector<16x128xbf16>
      tpu.vector_store %arg7[%c0_16, %c0_17], %22 {strides = array<i32>} : memref<16x128xbf16, #tpu.memory_space<vmem>>, vector<16x128xbf16>,
    } else {
    }
    return
  }
  func.func @transform_0(%arg0: i32, %arg1: i32, %arg2: i32) -> (i32, i32) {
    %c0_i32 = arith.constant 0 : i32
    return %arg0, %arg2 : i32, i32
  }
  func.func @transform_1(%arg0: i32, %arg1: i32, %arg2: i32) -> (i32, i32) {
    %c0_i32 = arith.constant 0 : i32
    return %arg2, %arg1 : i32, i32
  }
  func.func @transform_2(%arg0: i32, %arg1: i32, %arg2: i32) -> (i32, i32) {
    %c0_i32 = arith.constant 0 : i32
    return %arg2, %arg1 : i32, i32
  }
  func.func @transform_3(%arg0: i32, %arg1: i32, %arg2: i32) -> (i32, i32) {
    %c0_i32 = arith.constant 0 : i32
    %c0_i32_0 = arith.constant 0 : i32
    return %arg0, %c0_i32 : i32, i32
  }
  func.func @transform_4(%arg0: i32, %arg1: i32, %arg2: i32) -> (i32, i32) {
    %c0_i32 = arith.constant 0 : i32
    return %arg0, %arg1 : i32, i32
  }
}

module attributes {stable_mosaic.version = 11 : i64} {
  func.func @_mm_kernel(%arg0: i32, %arg1: i32, %arg2: i32, %arg3: memref<64x16xbf16, #tpu.memory_space<vmem>>, %arg4: memref<16x128xbf16, #tpu.memory_space<vmem>>, %arg5: memref<64x128xf32, #tpu.memory_space<vmem>>, %arg6: memref<64x128xf32, #tpu.memory_space<vmem>>) attributes {dimension_semantics = [#tpu.dimension_semantics<parallel>, #tpu.dimension_semantics<parallel>, #tpu.dimension_semantics<arbitrary>], iteration_bounds = array<i64: 1, 1, 1>, scalar_prefetch = 0 : i64, scratch_operands = 1 : i64, tpu.core_type = #tpu.core_type<tc>, window_params = [{transform_indices = @transform_0, window_bounds = array<i64: 64, 16>}, {transform_indices = @transform_1, window_bounds = array<i64: 16, 128>}, {transform_indices = @transform_2, window_bounds = array<i64: 64, 128>}]} {
    %c0_i32 = arith.constant 0 : i32
    %0 = arith.cmpi eq, %arg2, %c0_i32 : i32
    %1 = arith.extui %0 : i1 to i32
    %c0_i32_0 = arith.constant 0 : i32
    %2 = arith.cmpi ne, %1, %c0_i32_0 : i32
    scf.if %2 {
      %cst_10 = arith.constant 0.000000e+00 : f32
      %12 = vector.broadcast %cst_10 : f32 to vector<64x128xf32>
      %c0_11 = arith.constant 0 : index
      %c0_12 = arith.constant 0 : index
      %13 = vector.load %arg6[%c0_11, %c0_12] : memref<64x128xf32, #tpu.memory_space<vmem>>, vector<64x128xf32>
      tpu.vector_store %arg6[%c0_11, %c0_12], %12 {strides = array<i32>} : memref<64x128xf32, #tpu.memory_space<vmem>>, vector<64x128xf32>,
    } else {
    }
    %c0 = arith.constant 0 : index
    %c0_1 = arith.constant 0 : index
    %3 = vector.load %arg6[%c0, %c0_1] : memref<64x128xf32, #tpu.memory_space<vmem>>, vector<64x128xf32>
    %c0_2 = arith.constant 0 : index
    %c0_3 = arith.constant 0 : index
    %4 = vector.load %arg3[%c0_2, %c0_3] : memref<64x16xbf16, #tpu.memory_space<vmem>>, vector<64x16xbf16>
    %c0_4 = arith.constant 0 : index
    %c0_5 = arith.constant 0 : index
    %5 = vector.load %arg4[%c0_4, %c0_5] : memref<16x128xbf16, #tpu.memory_space<vmem>>, vector<16x128xbf16>
    %cst = arith.constant dense<0.000000e+00> : vector<64x128xf32>
    %6 = tpu.matmul %4, %5, %cst {dimension_numbers = #tpu.dot_dimension_numbers<[1], [0], [0], [1], [0, 0, 1, 1], [], []>} : vector<64x16xbf16>, vector<16x128xbf16>, vector<64x128xf32> -> vector<64x128xf32>
    %7 = arith.addf %3, %6 : vector<64x128xf32>
    %c0_6 = arith.constant 0 : index
    %c0_7 = arith.constant 0 : index
    %8 = vector.load %arg6[%c0_6, %c0_7] : memref<64x128xf32, #tpu.memory_space<vmem>>, vector<64x128xf32>
    tpu.vector_store %arg6[%c0_6, %c0_7], %7 {strides = array<i32>} : memref<64x128xf32, #tpu.memory_space<vmem>>, vector<64x128xf32>,
    %c0_i32_8 = arith.constant 0 : i32
    %9 = arith.cmpi eq, %arg2, %c0_i32_8 : i32
    %10 = arith.extui %9 : i1 to i32
    %c0_i32_9 = arith.constant 0 : i32
    %11 = arith.cmpi ne, %10, %c0_i32_9 : i32
    scf.if %11 {
      %c0_10 = arith.constant 0 : index
      %c0_11 = arith.constant 0 : index
      %12 = vector.load %arg6[%c0_10, %c0_11] : memref<64x128xf32, #tpu.memory_space<vmem>>, vector<64x128xf32>
      %c0_12 = arith.constant 0 : index
      %c0_13 = arith.constant 0 : index
      %13 = vector.load %arg5[%c0_12, %c0_13] : memref<64x128xf32, #tpu.memory_space<vmem>>, vector<64x128xf32>
      tpu.vector_store %arg5[%c0_12, %c0_13], %12 {strides = array<i32>} : memref<64x128xf32, #tpu.memory_space<vmem>>, vector<64x128xf32>,
    } else {
    }
    return
  }
  func.func @transform_0(%arg0: i32, %arg1: i32, %arg2: i32) -> (i32, i32) {
    %c0_i32 = arith.constant 0 : i32
    return %arg0, %arg2 : i32, i32
  }
  func.func @transform_1(%arg0: i32, %arg1: i32, %arg2: i32) -> (i32, i32) {
    %c0_i32 = arith.constant 0 : i32
    return %arg2, %arg1 : i32, i32
  }
  func.func @transform_2(%arg0: i32, %arg1: i32, %arg2: i32) -> (i32, i32) {
    %c0_i32 = arith.constant 0 : i32
    return %arg0, %arg1 : i32, i32
  }
}

module attributes {stable_mosaic.version = 11 : i64} {
  func.func @_mm_kernel(%arg0: i32, %arg1: i32, %arg2: i32, %arg3: memref<16x16xbf16, #tpu.memory_space<vmem>>, %arg4: memref<16x128xbf16, #tpu.memory_space<vmem>>, %arg5: memref<16x128xf32, #tpu.memory_space<vmem>>, %arg6: memref<16x128xf32, #tpu.memory_space<vmem>>) attributes {dimension_semantics = [#tpu.dimension_semantics<parallel>, #tpu.dimension_semantics<parallel>, #tpu.dimension_semantics<arbitrary>], iteration_bounds = array<i64: 1, 1, 1>, scalar_prefetch = 0 : i64, scratch_operands = 1 : i64, tpu.core_type = #tpu.core_type<tc>, window_params = [{transform_indices = @transform_0, window_bounds = array<i64: 16, 16>}, {transform_indices = @transform_1, window_bounds = array<i64: 16, 128>}, {transform_indices = @transform_2, window_bounds = array<i64: 16, 128>}]} {
    %c0_i32 = arith.constant 0 : i32
    %0 = arith.cmpi eq, %arg2, %c0_i32 : i32
    %1 = arith.extui %0 : i1 to i32
    %c0_i32_0 = arith.constant 0 : i32
    %2 = arith.cmpi ne, %1, %c0_i32_0 : i32
    scf.if %2 {
      %cst_10 = arith.constant 0.000000e+00 : f32
      %12 = vector.broadcast %cst_10 : f32 to vector<16x128xf32>
      %c0_11 = arith.constant 0 : index
      %c0_12 = arith.constant 0 : index
      %13 = vector.load %arg6[%c0_11, %c0_12] : memref<16x128xf32, #tpu.memory_space<vmem>>, vector<16x128xf32>
      tpu.vector_store %arg6[%c0_11, %c0_12], %12 {strides = array<i32>} : memref<16x128xf32, #tpu.memory_space<vmem>>, vector<16x128xf32>,
    } else {
    }
    %c0 = arith.constant 0 : index
    %c0_1 = arith.constant 0 : index
    %3 = vector.load %arg6[%c0, %c0_1] : memref<16x128xf32, #tpu.memory_space<vmem>>, vector<16x128xf32>
    %c0_2 = arith.constant 0 : index
    %c0_3 = arith.constant 0 : index
    %4 = vector.load %arg3[%c0_2, %c0_3] : memref<16x16xbf16, #tpu.memory_space<vmem>>, vector<16x16xbf16>
    %c0_4 = arith.constant 0 : index
    %c0_5 = arith.constant 0 : index
    %5 = vector.load %arg4[%c0_4, %c0_5] : memref<16x128xbf16, #tpu.memory_space<vmem>>, vector<16x128xbf16>
    %cst = arith.constant dense<0.000000e+00> : vector<16x128xf32>
    %6 = tpu.matmul %4, %5, %cst {dimension_numbers = #tpu.dot_dimension_numbers<[1], [0], [0], [1], [0, 0, 1, 1], [], []>} : vector<16x16xbf16>, vector<16x128xbf16>, vector<16x128xf32> -> vector<16x128xf32>
    %7 = arith.addf %3, %6 : vector<16x128xf32>
    %c0_6 = arith.constant 0 : index
    %c0_7 = arith.constant 0 : index
    %8 = vector.load %arg6[%c0_6, %c0_7] : memref<16x128xf32, #tpu.memory_space<vmem>>, vector<16x128xf32>
    tpu.vector_store %arg6[%c0_6, %c0_7], %7 {strides = array<i32>} : memref<16x128xf32, #tpu.memory_space<vmem>>, vector<16x128xf32>,
    %c0_i32_8 = arith.constant 0 : i32
    %9 = arith.cmpi eq, %arg2, %c0_i32_8 : i32
    %10 = arith.extui %9 : i1 to i32
    %c0_i32_9 = arith.constant 0 : i32
    %11 = arith.cmpi ne, %10, %c0_i32_9 : i32
    scf.if %11 {
      %c0_10 = arith.constant 0 : index
      %c0_11 = arith.constant 0 : index
      %12 = vector.load %arg6[%c0_10, %c0_11] : memref<16x128xf32, #tpu.memory_space<vmem>>, vector<16x128xf32>
      %c0_12 = arith.constant 0 : index
      %c0_13 = arith.constant 0 : index
      %13 = vector.load %arg5[%c0_12, %c0_13] : memref<16x128xf32, #tpu.memory_space<vmem>>, vector<16x128xf32>
      tpu.vector_store %arg5[%c0_12, %c0_13], %12 {strides = array<i32>} : memref<16x128xf32, #tpu.memory_space<vmem>>, vector<16x128xf32>,
    } else {
    }
    return
  }
  func.func @transform_0(%arg0: i32, %arg1: i32, %arg2: i32) -> (i32, i32) {
    %c0_i32 = arith.constant 0 : i32
    return %arg0, %arg2 : i32, i32
  }
  func.func @transform_1(%arg0: i32, %arg1: i32, %arg2: i32) -> (i32, i32) {
    %c0_i32 = arith.constant 0 : i32
    return %arg2, %arg1 : i32, i32
  }
  func.func @transform_2(%arg0: i32, %arg1: i32, %arg2: i32) -> (i32, i32) {
    %c0_i32 = arith.constant 0 : i32
    return %arg0, %arg1 : i32, i32
  }
}

</mosaic_0001>

<bundles_post_ra>
// kernel: _lambda_.13
= control target key start
LH: loop header
LB: loop body
LE: loop exit
PB: predicated region body
PF: predicated region fallthrough
CT: control target
= control target key end

     0   :  { %v202_v1 = vmov 0   ;;  %vm77_vm0 = vcmask 130048   ;;  %s247_s1 = inlined_call_operand.vmem [shape: bf16[16,128], index: 1, kind: input, shape index: {}]   ;;  %s248_s0 = inlined_call_operand.vmem [shape: bf16[32,16], index: 0, kind: input, shape index: {}]   ;;  %s249_s2 = inlined_call_operand.vmem [shape: f32[32,1], index: 2, kind: input, shape index: {}]   ;;  %s250_s3 = inlined_call_operand.vmem [shape: bf16[16,128], index: 3, kind: output, shape index: {}]  }
   0x1   :  { %v182_v0 = vld [vmem:[%s247_s1] sm:$0xff]  ;;  %192 = vset.pattern.permute.xlu0 %v202_v1  ;;  %v21_v2 = vld [vmem:[%s249_s2 + $0x10] sm:$0xff]  ;;  %193 = vset.pattern.permute.xlu1 %v202_v1  ;;  %v184_v3 = vld [vmem:[%s248_s0 + $0x8] sm:$0xff] }
   0x2   :  { %35 = vperm.xlu0 %192, %v21_v2   ;;  %v183_v4 = vld [vmem:[%s248_s0] sm:$0xff]  ;;  %190 = vmatpush.bf16.msra.mxu1 %v182_v0  ;;  %v22_v6 = vld [vmem:[%s249_s2 + $0x18] sm:$0xff]  ;;  %v20_v7 = vld [vmem:[%s249_s2 + $0x8] sm:$0xff] }
   0x3   :  { %v19_v5 = vld [vmem:[%s249_s2] sm:$0xff]  ;;  %91 = vmatpush.bf16.msra.mxu0 %v182_v0 }
   0x4   :  { %25 = vperm.xlu1 %193, %v19_v5  }
   0x5   :  { %179 = vmatmul.msk.bf16.vlgmr.msra.gmra.mxu1 %vm77_vm0, %v184_v3 }
   0x6   :  { %178 = vmatmul.msk.bf16.vlgmr.msra.gmra.mxu0 %vm77_vm0, %v183_v4 }
   0xa   :  { %40 = vperm.xlu0 %192, %v22_v6  }
   0xc   :  { %30 = vperm.xlu1 %193, %v20_v7  }
  0x74   :  { %v36_v8 = vpop.permute.xlu0 %35 }
  0x76   :  { %v26_v23 = vpop.permute.xlu1 %25 }
  0x7c   :  { %v41_v12 = vpop.permute.xlu0 %40 }
  0x7e   :  { %v31_v37 = vpop.permute.xlu1 %30 }
  0x82   :  { %v98_v9 = vpop.f32.mrf.mxu1 }
  0x83   :  { %v105_v10 = vadd.f32 %v98_v9, %v36_v8  ;;  %v93_v24 = vpop.f32.mrf.mxu0 }
  0x84   :  { %v103_v39 = vadd.f32 %v93_v24, %v26_v23 }
  0x85   :  { %v180_v11 = vmul.f32 -1.442695, %v105_v10 }
  0x87   :  { %194 = vpow2.f32 %v180_v11 }
  0x8a   :  { %v100_v13 = vpop.f32.mrf.mxu1 }
  0x8b   :  { %v106_v14 = vadd.f32 %v100_v13, %v41_v12  ;;  %v95_v38 = vpop.f32.mrf.mxu0 }
  0x8c   :  { %v104_v43 = vadd.f32 %v95_v38, %v31_v37 }
  0x8d   :  { %v195_v15 = vpop.eup %194  ;;  %v181_v16 = vmul.f32 -1.442695, %v106_v14 }
  0x8e   :  { %v124_v17 = vadd.f32 1.0, %v195_v15 }
  0x8f   :  { %196 = vpow2.f32 %v181_v16 }
  0x90   :  { %198 = vrcp.f32 %v124_v17  ;;  %v137_v29 = vand.u32 2147483648, %v124_v17  ;;  %vm131_vm2 = vweird.f32 %v124_v17  ;;  %v135_v30 = vand.u32 2147483647, %v124_v17 }
  0x92   :  { %v138_v36 = vor.u32 1.1754944e-38, %v137_v29  ;;  %vm136_vm5 = vcmp.eq.f32.partialorder %v135_v30, 8.507059e+37 }
  0x95   :  { %v197_v18 = vpop.eup %196 }
  0x96   :  { %v199_v19 = vpop.eup %198  ;;  %v125_v20 = vadd.f32 1.0, %v197_v18 }
  0x97   :  { %v127_v21 = vmul.f32 %v199_v19, %v124_v17  ;;  %vm132_vm1 = vweird.f32 %v199_v19 }
  0x98   :  { %200 = vrcp.f32 %v125_v20  ;;  %vm133_vm3 = vmor %vm131_vm2, %vm132_vm1  ;;  %v152_v32 = vand.u32 2147483648, %v125_v20  ;;  %v150_v35 = vand.u32 2147483647, %v125_v20  ;;  %vm146_vm6 = vweird.f32 %v125_v20 }
  0x99   :  { %v128_v22 = vsub.f32 1.0, %v127_v21 }
  0x9a   :  { %v153_v42 = vor.u32 1.1754944e-38, %v152_v32  ;;  %vm151_vm8 = vcmp.eq.f32.partialorder %v150_v35, 8.507059e+37 }
  0x9b   :  { %v129_v25 = vmul.f32 %v199_v19, %v128_v22 }
  0x9d   :  { %v130_v27 = vadd.f32 %v199_v19, %v129_v25 }
  0x9e   :  { %v201_v26 = vpop.eup %200 }
  0x9f   :  { %v142_v28 = vmul.f32 %v201_v26, %v125_v20  ;;  %v134_v33 = vsel %vm133_vm3, %v199_v19, %v130_v27  ;;  %vm147_vm4 = vweird.f32 %v201_v26 }
  0xa0   :  { %v139_v41 = vsel %vm136_vm5, %v138_v36, %v134_v33  ;;  %vm148_vm7 = vmor %vm146_vm6, %vm147_vm4 }
  0xa1   :  { %v143_v31 = vsub.f32 1.0, %v142_v28  ;;  %v156_v46 = vmul.f32 %v139_v41, %v103_v39 }
  0xa3   :  { %v144_v34 = vmul.f32 %v201_v26, %v143_v31 }
  0xa5   :  { %v145_v40 = vadd.f32 %v201_v26, %v144_v34 }
  0xa7   :  { %v149_v44 = vsel %vm148_vm7, %v201_v26, %v145_v40 }
  0xa8   :  { %v154_v45 = vsel %vm151_vm8, %v153_v42, %v149_v44 }
  0xa9   :  { %v157_v47 = vmul.f32 %v154_v45, %v104_v43 }
  0xab   :  { %v188_v48 = vpack.c.bf16 %v157_v47, %v156_v46 }
  0xad   :  { %189 = vst [vmem:[%s250_s3] sm:$0xff] %v188_v48  }

// kernel: _lambda_.12
= control target key start
LH: loop header
LB: loop body
LE: loop exit
PB: predicated region body
PF: predicated region fallthrough
CT: control target
= control target key end

     0   :  { %v107_v1 = vmov 0   ;;  %vm52_vm0 = vcmask 130048   ;;  %s143_s1 = inlined_call_operand.vmem [shape: bf16[16,128], index: 1, kind: input, shape index: {}]   ;;  %s144_s0 = inlined_call_operand.vmem [shape: bf16[16,16], index: 0, kind: input, shape index: {}]   ;;  %s145_s2 = inlined_call_operand.vmem [shape: f32[16,1], index: 2, kind: input, shape index: {}]   ;;  %s146_s3 = inlined_call_operand.vmem [shape: bf16[16,128], index: 3, kind: output, shape index: {}]  }
   0x1   :  { %v99_v0 = vld [vmem:[%s143_s1] sm:$0xff]  ;;  %106 = vset.pattern.permute.xlu0 %v107_v1  ;;  %v20_v4 = vld [vmem:[%s145_s2 + $0x8] sm:$0xff] }
   0x2   :  { %v19_v2 = vld [vmem:[%s145_s2] sm:$0xff]  ;;  %63 = vmatpush.bf16.msra.mxu0 %v99_v0 }
   0x3   :  { %v98_v3 = vld [vmem:[%s144_s0] sm:$0xff]  ;;  %23 = vperm.xlu0 %106, %v19_v2  }
   0x5   :  { %97 = vmatmul.msk.bf16.vlgmr.msra.gmra.mxu0 %vm52_vm0, %v98_v3 }
   0xb   :  { %28 = vperm.xlu0 %106, %v20_v4  }
  0x75   :  { %v24_v5 = vpop.permute.xlu0 %23 }
  0x7d   :  { %v29_v8 = vpop.permute.xlu0 %28 }
  0x82   :  { %v65_v6 = vpop.f32.mrf.mxu0 }
  0x83   :  { %v70_v7 = vadd.f32 %v65_v6, %v24_v5 }
  0x85   :  { %v79_v11 = vmax.f32 %v70_v7, 0.0 }
  0x8a   :  { %v67_v9 = vpop.f32.mrf.mxu0 }
  0x8b   :  { %v71_v10 = vadd.f32 %v67_v9, %v29_v8 }
  0x8d   :  { %v80_v12 = vmax.f32 %v71_v10, 0.0 }
  0x8f   :  { %v103_v13 = vpack.c.bf16 %v80_v12, %v79_v11 }
  0x91   :  { %104 = vst [vmem:[%s146_s3] sm:$0xff] %v103_v13  }

// kernel: _lambda_.14
= control target key start
LH: loop header
LB: loop body
LE: loop exit
PB: predicated region body
PF: predicated region fallthrough
CT: control target
= control target key end

     0   :  { %v146_v1 = vmov 0   ;;  %vm76_vm0 = vcmask 523264   ;;  %s191_s1 = inlined_call_operand.vmem [shape: bf16[64,128], index: 1, kind: input, shape index: {}]   ;;  %s192_s2 = inlined_call_operand.vmem [shape: f32[16,1], index: 2, kind: input, shape index: {}]   ;;  %s193_s0 = inlined_call_operand.vmem [shape: bf16[16,64], index: 0, kind: input, shape index: {}]   ;;  %s194_s3 = inlined_call_operand.vmem [shape: bf16[16,128], index: 3, kind: output, shape index: {}]  }
   0x1   :  { %v138_v0 = vld [vmem:[%s191_s1 + $0x18] sm:$0xff]  ;;  %145 = vset.pattern.permute.xlu0 %v146_v1  ;;  %v19_v2 = vld [vmem:[%s192_s2] sm:$0xff]  ;;  %v137_v3 = vld [vmem:[%s191_s1 + $0x10] sm:$0xff] }
   0x2   :  { %84 = vmatpush.bf16.msra.mxu0 %v138_v0  ;;  %23 = vperm.xlu0 %145, %v19_v2   ;;  %v136_v4 = vld [vmem:[%s191_s1 + $0x8] sm:$0xff]  ;;  %v135_v6 = vld [vmem:[%s191_s1] sm:$0xff] }
   0x3   :  { %v20_v5 = vld [vmem:[%s192_s2 + $0x8] sm:$0xff]  ;;  %v134_v7 = vld [vmem:[%s193_s0] sm:$0xff] }
   0x6   :  { %85 = vmatpush.bf16.msra.mxu0 %v137_v3 }
   0xa   :  { %86 = vmatpush.bf16.msra.mxu0 %v136_v4  ;;  %28 = vperm.xlu0 %145, %v20_v5  }
   0xe   :  { %87 = vmatpush.bf16.msra.mxu0 %v135_v6 }
  0x11   :  { %133 = vmatmul.msk.bf16.vlgmr.msra.gmra.mxu0 %vm76_vm0, %v134_v7 }
  0x74   :  { %v24_v8 = vpop.permute.xlu0 %23 }
  0x7c   :  { %v29_v11 = vpop.permute.xlu0 %28 }
  0x8e   :  { %v89_v9 = vpop.f32.mrf.mxu0 }
  0x8f   :  { %v94_v10 = vadd.f32 %v89_v9, %v24_v8 }
  0x91   :  { %v103_v14 = vmax.f32 %v94_v10, 0.0 }
  0x96   :  { %v91_v12 = vpop.f32.mrf.mxu0 }
  0x97   :  { %v95_v13 = vadd.f32 %v91_v12, %v29_v11 }
  0x99   :  { %v104_v15 = vmax.f32 %v95_v13, 0.0 }
  0x9b   :  { %v142_v16 = vpack.c.bf16 %v104_v15, %v103_v14 }
  0x9d   :  { %143 = vst [vmem:[%s194_s3] sm:$0xff] %v142_v16  }

// kernel: _lambda_.17
= control target key start
LH: loop header
LB: loop body
LE: loop exit
PB: predicated region body
PF: predicated region fallthrough
CT: control target
= control target key end

     0   :  { %vm16_vm0 = vcmask 123904   ;;  %v172_v0 = vmov 0.0   ;;  %s194_s9 = smov 0   ;;  %s218_s0 = inlined_call_operand.vmem [shape: f32[3,2,64], index: 0, kind: input, shape index: {}]   ;;  %s219_s1 = inlined_call_operand.vmem [shape: bf16[16,64], index: 1, kind: input, shape index: {}]   ;;  %s220_s2 = inlined_call_operand.vmem [shape: bf16[3,2,16], index: 2, kind: output, shape index: {}]  }
   0x1   :  { %17 = vst.msk [vmem:[#allocation2] sm:$0x3] %vm16_vm0, %v172_v0 }
   0x2   :  { %18 = vst.msk [vmem:[#allocation3] sm:$0x3] %vm16_vm0, %v172_v0 }
   0x3 LB: > { %v142_v1 = vld [vmem:[%s219_s1] sm:$0xff]  ;;  %vm38_vm1 = vcmask 130048   ;;  %s135_s12 = sshll.u32 %s170_s9, 1  ;;  %s173_s16 = smov 80   ;;  %vm112_vm6 = vcmask 1040384   ;;  %vm121_vm7 = vcmask 122880   ;;  %s170_s9 = sphi %s194_s9, %s24_s9  }
   0x4   : > { %49 = vmatpush.bf16.msra.mxu0 %v142_v1  ;;  %s26_s15 = scalar_lea.vmem %s218_s0, %s135_s12  ;;  %s174_s17 = smov 16  }
   0x5   : > { %v27_v4 = vld [vmem:[%s26_s15] sm:$0x3]  ;;  %s175_s18 = smov 112   ;;  %s176_s19 = smov 96  }
   0x6   : > { %s120_s22 = scalar_lea.vmem %s220_s2, %s170_s9  ;;  %s24_s9 = sadd.s32 1, %s170_s9  }
   0x7   : > { %p21_p0 = scmp.ge.s32.totalorder %s24_s9, 3  }
   0x8   : > { %v28_v2 = vld [vmem:[#allocation2] sm:$0x3] }
   0x9   : > { %v29_v3 = vpack.c.bf16 %v28_v2, %v28_v2  ;;  %v76_v9 = vld [vmem:[#allocation3] sm:$0x3] }
   0xb   : > { %140 = vmatmul.msk.bf16.vlgmr.msra.gmra.mxu0 %vm38_vm1, %v29_v3 }
  0x88   : > { %v51_v5 = vpop.f32.mrf.mxu0 }
  0x89   : > { %v55_v6 = vadd.f32 %v51_v5, %v27_v4 }
  0x8b   : > { %156 = vtanh.f32 %v55_v6  ;;  %v141_v10 = vmul.f32 -1.442695, %v55_v6 }
  0x8d   : > { %158 = vpow2.f32 %v141_v10 }
  0x90   : > { %v53_v7 = vpop.f32.mrf.mxu0 }
  0x91   : > { %v157_v8 = vpop.eup %156 }
  0x92   : > { %83 = vrot.lane.b32.xlu0 %v157_v8, %s173_s16 }
  0x93   : > { %v159_v11 = vpop.eup %158 }
  0x94   : > { %v59_v12 = vadd.f32 1.0, %v159_v11 }
  0x96   : > { %160 = vrcp.f32 %v59_v12  ;;  %v71_v18 = vand.u32 2147483648, %v59_v12  ;;  %vm65_vm3 = vweird.f32 %v59_v12  ;;  %v69_v19 = vand.u32 2147483647, %v59_v12 }
  0x98   : > { %v72_v21 = vor.u32 1.1754944e-38, %v71_v18  ;;  %vm70_vm5 = vcmp.eq.f32.partialorder %v69_v19, 8.507059e+37 }
  0x9a   : > { %78 = vrot.lane.b32.xlu0 %v76_v9, %s174_s17 }
  0x9c   : > { %v161_v13 = vpop.eup %160 }
  0x9d   : > { %v61_v14 = vmul.f32 %v161_v13, %v59_v12  ;;  %vm66_vm2 = vweird.f32 %v161_v13 }
  0x9e   : > { %vm67_vm4 = vmor %vm65_vm3, %vm66_vm2 }
  0x9f   : > { %v62_v15 = vsub.f32 1.0, %v61_v14 }
  0xa1   : > { %v63_v16 = vmul.f32 %v161_v13, %v62_v15 }
  0xa3   : > { %v64_v17 = vadd.f32 %v161_v13, %v63_v16 }
  0xa5   : > { %v68_v20 = vsel %vm67_vm4, %v161_v13, %v64_v17 }
  0xa6   : > { %v73_v23 = vsel %vm70_vm5, %v72_v21, %v68_v20 }
 0x104   : > { %v84_v22 = vpop.permute.xlu0 %83 }
 0x105   : > { %v86_v24 = vmul.f32 %v84_v22, %v73_v23 }
 0x107   : > { %88 = vrot.lane.b32.xlu1 %v86_v24, %s174_s17 }
 0x10c   : > { %v79_v25 = vpop.permute.xlu0 %78 }
 0x10d   : > { %v81_v26 = vmul.f32 %v79_v25, %v73_v23 }
 0x179   : > { %v89_v27 = vpop.permute.xlu1 %88 }
 0x17a   : > { %v91_v28 = vadd.f32 %v89_v27, %v81_v26 }
 0x17c   : > { %162 = vtanh.f32 %v91_v28  ;;  %99 = vrot.lane.b32.xlu2 %v91_v28, %s175_s18 }
 0x182   : > { %v163_v29 = vpop.eup %162 }
 0x183   : > { %94 = vrot.lane.b32.xlu1 %v163_v29, %s174_s17 }
 0x1d6   : > { %v100_v30 = vpop.permute.xlu2 %99 }
 0x1d7   : > { %103 = vst.msk [vmem:[#allocation3] sm:$0x3] %vm16_vm0, %v100_v30 }
 0x1f5   : > { %v95_v31 = vpop.permute.xlu1 %94 }
 0x1f6   : > { %v97_v32 = vmul.f32 %v95_v31, %v73_v23 }
 0x1f8   : > { %v109_v33 = vpack.c.bf16 %v97_v32, %v97_v32  ;;  %105 = vrot.lane.b32.xlu2 %v97_v32, %s176_s19 }
 0x1fa   : > { %v111_v34 = vrot.slane %v109_v33, 3 }
 0x1fc   : > { %v115_v35 = vsel %vm112_vm6, %v109_v33, %v111_v34 }
 0x1fd   : > { %117 = vrot.lane.b32.xlu0 %v115_v35, %s176_s19 }
 0x252   : > { %v106_v36 = vpop.permute.xlu2 %105 }
 0x253   : > { %108 = vst.msk [vmem:[#allocation2] sm:$0x3] %vm16_vm0, %v106_v36 }
 0x26c   :  { %23 = sbr.rel (!%p21_p0) target bundleno = 3 (0x3), region = 41 }
 0x26f   : > { %v118_v37 = vpop.permute.xlu0 %117 }
 0x270   : > { %122 = vst.msk [vmem:[%s120_s22] sm:$0x1] %vm121_vm7, %v118_v37 }

// kernel: _lambda_.16
= control target key start
LH: loop header
LB: loop body
LE: loop exit
PB: predicated region body
PF: predicated region fallthrough
CT: control target
= control target key end

     0   :  { %vm43_vm0 = vcmask 130048   ;;  %s123_s1 = inlined_call_operand.vmem [shape: bf16[16,128], index: 1, kind: input, shape index: {}]   ;;  %s124_s0 = inlined_call_operand.vmem [shape: bf16[16,16], index: 0, kind: input, shape index: {}]   ;;  %s125_s2 = inlined_call_operand.vmem [shape: f32[1,128], index: 2, kind: input, shape index: {}]   ;;  %s126_s3 = inlined_call_operand.vmem [shape: f32[16,128], index: 3, kind: output, shape index: {}]  }
   0x1   :  { %v86_v0 = vld [vmem:[%s123_s1] sm:$0xff] }
   0x2   :  { %v85_v1 = vld [vmem:[%s124_s0] sm:$0xff]  ;;  %54 = vmatpush.bf16.msra.mxu0 %v86_v0 }
   0x3   :  { %v87_v2 = vld [vmem:[%s125_s2] ss:$0 sm:$0xff] }
   0x5   :  { %84 = vmatmul.msk.bf16.vlgmr.msra.gmra.mxu0 %vm43_vm0, %v85_v1 }
  0x82   :  { %v56_v3 = vpop.f32.mrf.mxu0 }
  0x83   :  { %v61_v4 = vadd.f32 %v87_v2, %v56_v3 }
  0x85   :  { %70 = vst [vmem:[%s126_s3] sm:$0xff] %v61_v4 }
  0x8a   :  { %v58_v5 = vpop.f32.mrf.mxu0 }
  0x8b   :  { %v62_v6 = vadd.f32 %v87_v2, %v58_v5 }
  0x8d   :  { %71 = vst [vmem:[%s126_s3 + $0x8] sm:$0xff] %v62_v6 }

// kernel: _lambda_.20
= control target key start
LH: loop header
LB: loop body
LE: loop exit
PB: predicated region body
PF: predicated region fallthrough
CT: control target
= control target key end

     0   :  { %v211_v2 = vmov 0   ;;  %vm83_vm0 = vcmask 130048   ;;  %s264_s1 = inlined_call_operand.vmem [shape: bf16[16,128], index: 1, kind: input, shape index: {}]   ;;  %s265_s2 = inlined_call_operand.vmem [shape: bf16[16,128], index: 2, kind: input, shape index: {}]   ;;  %s266_s3 = inlined_call_operand.vmem [shape: f32[32,1], index: 3, kind: input, shape index: {}]   ;;  %s267_s0 = inlined_call_operand.vmem [shape: bf16[32,16], index: 0, kind: input, shape index: {}]   ;;  %s268_s4 = inlined_call_operand.vmem [shape: bf16[16,128], index: 4, kind: output, shape index: {}]  }
   0x1   :  { %v187_v0 = vld [vmem:[%s264_s1] sm:$0xff]   ;;  %201 = vset.pattern.permute.xlu0 %v211_v2  ;;  %202 = vset.pattern.permute.xlu1 %v211_v2  ;;  %v24_v7 = vld [vmem:[%s266_s3 + $0x10] sm:$0xff]  ;;  %v185_v12 = vld [vmem:[%s267_s0 + $0x8] sm:$0xff] }
   0x2   :  { %v191_v1 = vld [vmem:[%s265_s2] sm:$0xff]   ;;  %v188_v3 = vunpack.c.l.bf16 %v187_v0  ;;  %v189_v4 = vunpack.c.h.bf16 %v187_v0  ;;  %38 = vperm.xlu0 %201, %v24_v7   ;;  %v25_v13 = vld [vmem:[%s266_s3 + $0x18] sm:$0xff]  ;;  %v23_v15 = vld [vmem:[%s266_s3 + $0x8] sm:$0xff] }
   0x3   :  { %v192_v5 = vunpack.c.l.bf16 %v191_v1  ;;  %v193_v6 = vunpack.c.h.bf16 %v191_v1  ;;  %v22_v8 = vld [vmem:[%s266_s3] sm:$0xff] }
   0x4   :  { %28 = vperm.xlu1 %202, %v22_v8   ;;  %v184_v14 = vld [vmem:[%s267_s0] sm:$0xff] }
   0x5   :  { %v62_v9 = vadd.f32 %v192_v5, %v188_v3  ;;  %v63_v10 = vadd.f32 %v193_v6, %v189_v4 }
   0x7   :  { %v64_v11 = vpack.c.bf16 %v63_v10, %v62_v9 }
   0x9   :  { %199 = vmatpush.bf16.msra.mxu1 %v64_v11  ;;  %97 = vmatpush.bf16.msra.mxu0 %v64_v11 }
   0xa   :  { %43 = vperm.xlu0 %201, %v25_v13  }
   0xc   :  { %181 = vmatmul.msk.bf16.vlgmr.msra.gmra.mxu1 %vm83_vm0, %v185_v12  ;;  %180 = vmatmul.msk.bf16.vlgmr.msra.gmra.mxu0 %vm83_vm0, %v184_v14 }
   0xd   :  { %33 = vperm.xlu1 %202, %v23_v15  }
  0x74   :  { %v39_v16 = vpop.permute.xlu0 %38 }
  0x76   :  { %v29_v31 = vpop.permute.xlu1 %28 }
  0x7c   :  { %v44_v20 = vpop.permute.xlu0 %43 }
  0x7f   :  { %v34_v45 = vpop.permute.xlu1 %33 }
  0x89   :  { %v104_v17 = vpop.f32.mrf.mxu1  ;;  %v99_v32 = vpop.f32.mrf.mxu0 }
  0x8a   :  { %v111_v18 = vadd.f32 %v104_v17, %v39_v16  ;;  %v109_v47 = vadd.f32 %v99_v32, %v29_v31 }
  0x8c   :  { %v182_v19 = vmul.f32 -1.442695, %v111_v18 }
  0x8e   :  { %203 = vpow2.f32 %v182_v19 }
  0x91   :  { %v106_v21 = vpop.f32.mrf.mxu1  ;;  %v101_v46 = vpop.f32.mrf.mxu0 }
  0x92   :  { %v112_v22 = vadd.f32 %v106_v21, %v44_v20  ;;  %v110_v51 = vadd.f32 %v101_v46, %v34_v45 }
  0x94   :  { %v204_v23 = vpop.eup %203  ;;  %v183_v24 = vmul.f32 -1.442695, %v112_v22 }
  0x95   :  { %v130_v25 = vadd.f32 1.0, %v204_v23 }
  0x96   :  { %205 = vpow2.f32 %v183_v24 }
  0x97   :  { %207 = vrcp.f32 %v130_v25  ;;  %v143_v37 = vand.u32 2147483648, %v130_v25  ;;  %vm137_vm2 = vweird.f32 %v130_v25  ;;  %v141_v38 = vand.u32 2147483647, %v130_v25 }
  0x99   :  { %v144_v44 = vor.u32 1.1754944e-38, %v143_v37  ;;  %vm142_vm5 = vcmp.eq.f32.partialorder %v141_v38, 8.507059e+37 }
  0x9c   :  { %v206_v26 = vpop.eup %205 }
  0x9d   :  { %v208_v27 = vpop.eup %207  ;;  %v131_v28 = vadd.f32 1.0, %v206_v26 }
  0x9e   :  { %v133_v29 = vmul.f32 %v208_v27, %v130_v25  ;;  %vm138_vm1 = vweird.f32 %v208_v27 }
  0x9f   :  { %209 = vrcp.f32 %v131_v28  ;;  %vm139_vm3 = vmor %vm137_vm2, %vm138_vm1  ;;  %v158_v40 = vand.u32 2147483648, %v131_v28  ;;  %v156_v43 = vand.u32 2147483647, %v131_v28  ;;  %vm152_vm6 = vweird.f32 %v131_v28 }
  0xa0   :  { %v134_v30 = vsub.f32 1.0, %v133_v29 }
  0xa1   :  { %v159_v50 = vor.u32 1.1754944e-38, %v158_v40  ;;  %vm157_vm8 = vcmp.eq.f32.partialorder %v156_v43, 8.507059e+37 }
  0xa2   :  { %v135_v33 = vmul.f32 %v208_v27, %v134_v30 }
  0xa4   :  { %v136_v35 = vadd.f32 %v208_v27, %v135_v33 }
  0xa5   :  { %v210_v34 = vpop.eup %209 }
  0xa6   :  { %v148_v36 = vmul.f32 %v210_v34, %v131_v28  ;;  %v140_v41 = vsel %vm139_vm3, %v208_v27, %v136_v35  ;;  %vm153_vm4 = vweird.f32 %v210_v34 }
  0xa7   :  { %v145_v49 = vsel %vm142_vm5, %v144_v44, %v140_v41  ;;  %vm154_vm7 = vmor %vm152_vm6, %vm153_vm4 }
  0xa8   :  { %v149_v39 = vsub.f32 1.0, %v148_v36  ;;  %v162_v54 = vmul.f32 %v145_v49, %v109_v47 }
  0xaa   :  { %v150_v42 = vmul.f32 %v210_v34, %v149_v39 }
  0xac   :  { %v151_v48 = vadd.f32 %v210_v34, %v150_v42 }
  0xae   :  { %v155_v52 = vsel %vm154_vm7, %v210_v34, %v151_v48 }
  0xaf   :  { %v160_v53 = vsel %vm157_vm8, %v159_v50, %v155_v52 }
  0xb0   :  { %v163_v55 = vmul.f32 %v160_v53, %v110_v51 }
  0xb2   :  { %v197_v56 = vpack.c.bf16 %v163_v55, %v162_v54 }
  0xb4   :  { %198 = vst [vmem:[%s268_s4] sm:$0xff] %v197_v56  }

// kernel: _lambda_.21
= control target key start
LH: loop header
LB: loop body
LE: loop exit
PB: predicated region body
PF: predicated region fallthrough
CT: control target
= control target key end

     0   :  { %vm68_vm0 = vcmask 130048   ;;  %s235_s1 = inlined_call_operand.vmem [shape: bf16[16,128], index: 1, kind: input, shape index: {}]   ;;  %s236_s0 = inlined_call_operand.vmem [shape: bf16[64,16], index: 0, kind: input, shape index: {}]   ;;  %s237_s2 = inlined_call_operand.vmem [shape: f32[64,128], index: 2, kind: output, shape index: {}]  }
   0x1   :  { %v177_v0 = vld [vmem:[%s235_s1] sm:$0xff]  ;;  %v174_v2 = vld [vmem:[%s236_s0 + $0x8] sm:$0xff]  ;;  %v175_v3 = vld [vmem:[%s236_s0 + $0x10] sm:$0xff] }
   0x2   :  { %v173_v1 = vld [vmem:[%s236_s0] sm:$0xff]  ;;  %88 = vmatpush.bf16.msra.mxu0 %v177_v0  ;;  %178 = vmatpush.bf16.msra.mxu1 %v177_v0  ;;  %v176_v4 = vld [vmem:[%s236_s0 + $0x18] sm:$0xff] }
   0x3   :  { %179 = vmatpush.bf16.msra.mxu2 %v177_v0  ;;  %180 = vmatpush.bf16.msra.mxu3 %v177_v0 }
   0x5   :  { %169 = vmatmul.msk.bf16.vlgmr.msra.gmra.mxu0 %vm68_vm0, %v173_v1  ;;  %170 = vmatmul.msk.bf16.vlgmr.msra.gmra.mxu1 %vm68_vm0, %v174_v2 }
   0x6   :  { %171 = vmatmul.msk.bf16.vlgmr.msra.gmra.mxu2 %vm68_vm0, %v175_v3  ;;  %172 = vmatmul.msk.bf16.vlgmr.msra.gmra.mxu3 %vm68_vm0, %v176_v4 }
  0x82   :  { %v90_v5 = vpop.f32.mrf.mxu0  ;;  %v95_v6 = vpop.f32.mrf.mxu1 }
  0x83   :  { %137 = vst [vmem:[%s237_s2] sm:$0xff] %v90_v5 }
  0x84   :  { %139 = vst [vmem:[%s237_s2 + $0x10] sm:$0xff] %v95_v6 }
  0x89   :  { %v100_v7 = vpop.f32.mrf.mxu2  ;;  %v105_v8 = vpop.f32.mrf.mxu3 }
  0x8a   :  { %141 = vst [vmem:[%s237_s2 + $0x20] sm:$0xff] %v100_v7  ;;  %v92_v9 = vpop.f32.mrf.mxu0  ;;  %v97_v10 = vpop.f32.mrf.mxu1 }
  0x8b   :  { %143 = vst [vmem:[%s237_s2 + $0x30] sm:$0xff] %v105_v8 }
  0x8c   :  { %138 = vst [vmem:[%s237_s2 + $0x8] sm:$0xff] %v92_v9 }
  0x8d   :  { %140 = vst [vmem:[%s237_s2 + $0x18] sm:$0xff] %v97_v10 }
  0x91   :  { %v102_v11 = vpop.f32.mrf.mxu2  ;;  %v107_v12 = vpop.f32.mrf.mxu3 }
  0x92   :  { %142 = vst [vmem:[%s237_s2 + $0x28] sm:$0xff] %v102_v11 }
  0x93   :  { %144 = vst [vmem:[%s237_s2 + $0x38] sm:$0xff] %v107_v12 }

// kernel: _lambda_.23
= control target key start
LH: loop header
LB: loop body
LE: loop exit
PB: predicated region body
PF: predicated region fallthrough
CT: control target
= control target key end

     0   :  { %vm35_vm0 = vcmask 130048   ;;  %s106_s1 = inlined_call_operand.vmem [shape: bf16[16,128], index: 1, kind: input, shape index: {}]   ;;  %s107_s0 = inlined_call_operand.vmem [shape: bf16[16,16], index: 0, kind: input, shape index: {}]   ;;  %s108_s2 = inlined_call_operand.vmem [shape: f32[16,128], index: 2, kind: output, shape index: {}]  }
   0x1   :  { %v78_v0 = vld [vmem:[%s106_s1] sm:$0xff] }
   0x2   :  { %v77_v1 = vld [vmem:[%s107_s0] sm:$0xff]  ;;  %46 = vmatpush.bf16.msra.mxu0 %v78_v0 }
   0x5   :  { %76 = vmatmul.msk.bf16.vlgmr.msra.gmra.mxu0 %vm35_vm0, %v77_v1 }
  0x82   :  { %v48_v2 = vpop.f32.mrf.mxu0 }
  0x83   :  { %62 = vst [vmem:[%s108_s2] sm:$0xff] %v48_v2 }
  0x8a   :  { %v50_v3 = vpop.f32.mrf.mxu0 }
  0x8b   :  { %63 = vst [vmem:[%s108_s2 + $0x8] sm:$0xff] %v50_v3 }

</bundles_post_ra>
